<compile_context>
chip_gen: v6e
topology: v6e:2x2x1
jax: 0.10.0
libtpu: 0.0.40
codegen_flags: <defaults>
</compile_context>

<pallas_src>
import math

import jax
import jax.numpy as jnp
from jax.experimental import pallas as pl
from jax.experimental.pallas import tpu as pltpu


def lol_kernel(coef_ref, xt_ref,
               w1a_ref, b1a_ref, w1b_ref, b1b_ref,
               w2a_ref, b2a_ref, w2b_ref, b2b_ref, w2c_ref, b2c_ref,
               out_ref):
    """One batch tile: activations are (features, TB), batch on the lane axis."""
    xt = xt_ref[...]                                       # (10, TB) f32

    def attn(act, base):
        # Two-head attention + Wo projection collapsed to per-head scalars:
        #   scores[i,j,b] = c_h * act[i,b]*act[j,b]
        #   result[i,b]   = sum_h s_h * sum_j softmax_i(scores)[i,j,b]*act[j,b]
        # torch Softmax(dim=1) normalizes over the row (i) axis == axis 0 here.
        # Exact column max in closed form (no (S,S,TB) max-reduce):
        #   max_i c*x_i*x_j = (c*x_j) * (xmax_b if c*x_j >= 0 else xmin_b)
        xmax = jnp.max(act, axis=0, keepdims=True)         # (1, TB) shared by both heads (XLU)
        xmin = jnp.min(act, axis=0, keepdims=True)         # (1, TB)
        out = None
        for h in range(2):
            c = coef_ref[base + h]                         # (Wq_h . Wk_h)/sqrt(16)  (SMEM scalar)
            s = coef_ref[base + 2 + h]                     # Wv_h . Wo[16h:16h+16]   (SMEM scalar)
            ca = act * c                                   # (S, TB): fold c into one factor
            scores = ca[:, None, :] * act[None, :, :]      # (S, S, TB), no shared xx temp
            m = ca * jnp.where(ca >= 0.0, xmax, xmin)      # (S, TB) exact per-column max over i
            e = jnp.exp(scores - m[None, :, :])            # entries <= 1, max term == 1
            denom = jnp.sum(e, axis=0)                     # (S, TB), in [1, S]  (VPU adds)
            r = act * pl.reciprocal(denom, approx=True)    # x_j / denom_j  (EUP recip)
            w = jnp.sum(e * r[None, :, :], axis=1)         # (S, TB): sum_j probs[i,j]*x_j (XLU)
            contrib = s * w
            out = contrib if out is None else out + contrib
        return out                                         # (S, TB)

    def dense_relu(w_ref, b_ref, a, bf16=False):
        if bf16:
            a = a.astype(jnp.bfloat16)                     # weights already bf16 (wrapper)
        y = jnp.dot(w_ref[...], a, preferred_element_type=jnp.float32) + b_ref[...]
        return jnp.maximum(y, 0.0)

    y = attn(xt, 0)                                        # (10, TB)   attention block 1
    # layer1 stays f32: its output feeds the exp-amplifying attention block 2.
    y = dense_relu(w1a_ref, b1a_ref, y)                    # (128, TB)  Linear+BN+ReLU
    y = dense_relu(w1b_ref, b1b_ref, y)                    # (10, TB)
    y = attn(y, 4)                                         # (10, TB)   attention block 2
    # layer2 on bf16 operands, f32 MXU accumulation (dominant matmul is 256x128).
    y = dense_relu(w2a_ref, b2a_ref, y, bf16=True)         # (128, TB)
    y = dense_relu(w2b_ref, b2b_ref, y, bf16=True)         # (256, TB)
    out_ref[...] = (jnp.dot(w2c_ref[...], y.astype(jnp.bfloat16),
                            preferred_element_type=jnp.float32)
                    + b2c_ref[...])                        # (2, TB)  lane-dense output


def _round_up(n, m):
    return ((n + m - 1) // m) * m


def _attention_coefs(aw, wo):
    """[c_h0, c_h1, s_h0, s_h1] for one attention block (aw=(6,16), wo=(32,1))."""
    c = jnp.stack([jnp.dot(aw[0], aw[1]), jnp.dot(aw[3], aw[4])]) / math.sqrt(16.0)
    s = jnp.stack([jnp.dot(aw[2], wo[:16, 0]), jnp.dot(aw[5], wo[16:, 0])])
    return jnp.concatenate([c, s])


def lol_forward(x, p, *, tb=None):
    """x: (B, 10, 1) float32 — same layout as the torch module input."""
    B = x.shape[0]
    # Feature-major (10, B): keeps the batch on the 128-lane axis in the kernel.
    # TODO(synk): in a real pipeline the upstream producer should emit this
    # layout directly (fuse the transpose) instead of this one XLA transpose.
    xt = jnp.transpose(x[:, :, 0], (1, 0))

    # Batch tile (lane) size: multiple of 128, default 4096 (per-step overhead
    # amortized below ~10%).  Keep >=2 grid steps when the padded batch allows
    # it so dimension_semantics=("parallel",) can feed both TensorCores on v7x.
    bp128 = _round_up(B, 128)
    if tb is None:
        tb = 4096
    tb = max(128, min(_round_up(tb, 128), bp128))
    if bp128 >= 256 and tb >= bp128:
        tb = max(128, (bp128 // 2) // 128 * 128)
    bp = _round_up(B, tb)
    if bp != B:
        xt = jnp.pad(xt, ((0, 0), (0, bp - B)))

    # 8 scalar attention coefficients, kept in SMEM.
    coef = jnp.concatenate([_attention_coefs(p['aw1'], p['wo1']),
                            _attention_coefs(p['aw2'], p['wo2'])]).astype(jnp.float32)

    # layer2 weights pre-cast to bf16 once (MXU-native rate); biases stay f32.
    weights = (p['w1a'], p['b1a'], p['w1b'], p['b1b'],
               p['w2a'].astype(jnp.bfloat16), p['b2a'],
               p['w2b'].astype(jnp.bfloat16), p['b2b'],
               p['w2c'].astype(jnp.bfloat16), p['b2c'])

    # VMEM budget: ~3.5 KB/batch element per tile covers the (10,10,TB) f32
    # attention temporaries, the (256,TB)/(128,TB) activations and the
    # double-buffered (10,TB) input, plus fixed slack for weights/scratch.
    # 32 MiB floor keeps v5e (16 MiB default scoped) from rejecting big tiles;
    # 64 MiB cap stays inside v7x physical VMEM.
    vmem_limit = int(min(64 * 2**20, max(32 * 2**20, 4 * 2**20 + 3584 * tb)))

    def full_spec(a):
        return pl.BlockSpec(a.shape, lambda i: (0, 0))     # tiny constant operand

    out = pl.pallas_call(
        lol_kernel,
        grid=(bp // tb,),
        out_shape=jax.ShapeDtypeStruct((2, bp), jnp.float32),
        in_specs=([pl.BlockSpec(memory_space=pltpu.MemorySpace.SMEM),   # attention scalars
                   pl.BlockSpec((10, tb), lambda i: (0, i))]            # batch-tiled input
                  + [full_spec(a) for a in weights]),
        out_specs=pl.BlockSpec((2, tb), lambda i: (0, i)),              # lane-dense (2, TB)
        compiler_params=pltpu.CompilerParams(
            dimension_semantics=("parallel",),              # shard batch tiles across TCs
            vmem_limit_bytes=vmem_limit),
    )(coef, xt, *weights)
    return out[:, :B].T                                     # (B, 2)


def init_params(key):
    ks = jax.random.split(key, 9)

    def randn(k, shape):
        return jax.random.normal(k, shape, dtype=jnp.float32)

    def linear(k, in_f, out_f):
        k1, k2 = jax.random.split(k)
        bound = 1.0 / math.sqrt(in_f)
        w = jax.random.uniform(k1, (out_f, in_f), minval=-bound, maxval=bound,
                               dtype=jnp.float32)
        b = jax.random.uniform(k2, (out_f,), minval=-bound, maxval=bound,
                               dtype=jnp.float32)
        return w, b

    def linear_bn(k, in_f, out_f, eps=1e-5):
        # Fold eval-mode BatchNorm1d (mean=0, var=1, gamma=1, beta=0).
        w, b = linear(k, in_f, out_f)
        scale = 1.0 / math.sqrt(1.0 + eps)
        return w * scale, (b * scale).reshape(out_f, 1)

    p = {}
    # Attention weights stacked [Wq, Wk, Wv] x 2 heads (each torch.randn(1,16)).
    p['aw1'] = randn(ks[0], (6, 16))
    p['wo1'] = randn(ks[1], (32, 1))
    p['aw2'] = randn(ks[2], (6, 16))
    p['wo2'] = randn(ks[3], (32, 1))
    p['w1a'], p['b1a'] = linear_bn(ks[4], 10, 128)
    p['w1b'], p['b1b'] = linear_bn(ks[5], 128, 10)
    p['w2a'], p['b2a'] = linear_bn(ks[6], 10, 128)
    p['w2b'], p['b2b'] = linear_bn(ks[7], 128, 256)
    w2c, b2c = linear(ks[8], 256, 2)
    p['w2c'], p['b2c'] = w2c, b2c.reshape(2, 1)
    return p


def ref_forward(x, p):
    """Pure-JAX reference mirroring the torch forward (eval mode), full matrices."""
    def attn_block(x3, aw, wo):
        outs = []
        for h in range(2):
            wq, wk, wv = aw[3*h:3*h+1], aw[3*h+1:3*h+2], aw[3*h+2:3*h+3]
            q, k, v = x3 @ wq, x3 @ wk, x3 @ wv           # (B, S, 16)
            a = jnp.einsum('bid,bjd->bij', q, k) / math.sqrt(16.0)
            a = jax.nn.softmax(a, axis=1)                 # torch Softmax(dim=1)
            outs.append(jnp.einsum('bij,bjd->bid', a, v))
        cat = jnp.concatenate(outs, axis=2)               # (B, S, 32)
        return (cat @ wo)[:, :, 0]                        # (B, S)

    def dense(y, w, b):
        return y @ w.T + b[:, 0]

    y = attn_block(x, p['aw1'], p['wo1'])
    y = jax.nn.relu(dense(y, p['w1a'], p['b1a']))
    y = jax.nn.relu(dense(y, p['w1b'], p['b1b']))
    y = attn_block(y[:, :, None], p['aw2'], p['wo2'])
    y = jax.nn.relu(dense(y, p['w2a'], p['b2a']))
    y = jax.nn.relu(dense(y, p['w2b'], p['b2b']))
    return dense(y, p['w2c'], p['b2c'])


def _max_rel_err(a, b):
    return float(jnp.max(jnp.abs(a - b)) / (jnp.max(jnp.abs(b)) + 1e-6))


if __name__ == "__main__":
    key = jax.random.PRNGKey(0)
    kx, kp, kx2 = jax.random.split(key, 3)
    params = init_params(kp)

    # Tolerance covers the approximate EUP reciprocal in the softmax and the
    # bf16 layer-2 matmul operands (f32 accumulation).
    TOL = 2e-2

    # Small demo batch (single grid step).
    B = 2
    x = jax.random.normal(kx, (B, 10, 1), dtype=jnp.float32)
    out = lol_forward(x, params)
    jax.block_until_ready(out)
    ref = ref_forward(x, params)
    assert out.shape == (B, 2), out.shape
    assert bool(jnp.all(jnp.isfinite(out)))
    assert _max_rel_err(out, ref) < TOL, (_max_rel_err(out, ref), out, ref)

    # Non-multiple-of-128 batch: exercises padding, the >=2-step "parallel"
    # batch grid heuristic and the multi-tile pipeline.
    B2 = 260
    x2 = jax.random.normal(kx2, (B2, 10, 1), dtype=jnp.float32)
    out2 = lol_forward(x2, params)                        # heuristic -> 3 tiles of 128
    jax.block_until_ready(out2)
    ref2 = ref_forward(x2, params)
    assert out2.shape == (B2, 2), out2.shape
    assert bool(jnp.all(jnp.isfinite(out2)))
    assert _max_rel_err(out2, ref2) < TOL, _max_rel_err(out2, ref2)

    print("KERNEL_OK")
</pallas_src>

<mosaic_0001>
module attributes {stable_mosaic.version = 11 : i64} {
  func.func @lol_kernel(%arg0: i32, %arg1: memref<8xf32, #tpu.memory_space<smem>>, %arg2: memref<10x128xf32, #tpu.memory_space<vmem>>, %arg3: memref<128x10xf32, #tpu.memory_space<vmem>>, %arg4: memref<128x1xf32, #tpu.memory_space<vmem>>, %arg5: memref<10x128xf32, #tpu.memory_space<vmem>>, %arg6: memref<10x1xf32, #tpu.memory_space<vmem>>, %arg7: memref<128x10xbf16, #tpu.memory_space<vmem>>, %arg8: memref<128x1xf32, #tpu.memory_space<vmem>>, %arg9: memref<256x128xbf16, #tpu.memory_space<vmem>>, %arg10: memref<256x1xf32, #tpu.memory_space<vmem>>, %arg11: memref<2x256xbf16, #tpu.memory_space<vmem>>, %arg12: memref<2x1xf32, #tpu.memory_space<vmem>>, %arg13: memref<2x128xf32, #tpu.memory_space<vmem>>) attributes {dimension_semantics = [#tpu.dimension_semantics<parallel>], iteration_bounds = array<i64: 1>, scalar_prefetch = 0 : i64, scratch_operands = 0 : i64, tpu.core_type = #tpu.core_type<tc>, window_params = [{transform_indices = @transform_0, window_bounds = array<i64: 8>}, {transform_indices = @transform_1, window_bounds = array<i64: 10, 128>}, {pipeline_mode = #tpu.pipeline_mode<synchronous>, transform_indices = @transform_2, window_bounds = array<i64: 128, 10>}, {pipeline_mode = #tpu.pipeline_mode<synchronous>, transform_indices = @transform_3, window_bounds = array<i64: 128, 1>}, {pipeline_mode = #tpu.pipeline_mode<synchronous>, transform_indices = @transform_4, window_bounds = array<i64: 10, 128>}, {pipeline_mode = #tpu.pipeline_mode<synchronous>, transform_indices = @transform_5, window_bounds = array<i64: 10, 1>}, {pipeline_mode = #tpu.pipeline_mode<synchronous>, transform_indices = @transform_6, window_bounds = array<i64: 128, 10>}, {pipeline_mode = #tpu.pipeline_mode<synchronous>, transform_indices = @transform_7, window_bounds = array<i64: 128, 1>}, {pipeline_mode = #tpu.pipeline_mode<synchronous>, transform_indices = @transform_8, window_bounds = array<i64: 256, 128>}, {pipeline_mode = #tpu.pipeline_mode<synchronous>, transform_indices = @transform_9, window_bounds = array<i64: 256, 1>}, {pipeline_mode = #tpu.pipeline_mode<synchronous>, transform_indices = @transform_10, window_bounds = array<i64: 2, 256>}, {pipeline_mode = #tpu.pipeline_mode<synchronous>, transform_indices = @transform_11, window_bounds = array<i64: 2, 1>}, {transform_indices = @transform_12, window_bounds = array<i64: 2, 128>}]} {
    %c0 = arith.constant 0 : index
    %c0_0 = arith.constant 0 : index
    %0 = vector.load %arg2[%c0, %c0_0] : memref<10x128xf32, #tpu.memory_space<vmem>>, vector<10x128xf32>
    %cst = arith.constant dense<0xFF800000> : vector<128xf32>
    %1 = vector.multi_reduction <maximumf>, %0, %cst [0] : vector<10x128xf32> to vector<128xf32>
    %2 = vector.shape_cast %1 : vector<128xf32> to vector<1x128xf32>
    %cst_1 = arith.constant dense<0x7F800000> : vector<128xf32>
    %3 = vector.multi_reduction <minimumf>, %0, %cst_1 [0] : vector<10x128xf32> to vector<128xf32>
    %4 = vector.shape_cast %3 : vector<128xf32> to vector<1x128xf32>
    %c0_2 = arith.constant 0 : index
    %5 = memref.load %arg1[%c0_2] : memref<8xf32, #tpu.memory_space<smem>>
    %c2 = arith.constant 2 : index
    %6 = memref.load %arg1[%c2] : memref<8xf32, #tpu.memory_space<smem>>
    %7 = vector.broadcast %5 : f32 to vector<10x128xf32>
    %8 = arith.mulf %0, %7 : vector<10x128xf32>
    %9 = vector.shape_cast %8 : vector<10x128xf32> to vector<10x1x128xf32>
    %10 = vector.shape_cast %0 : vector<10x128xf32> to vector<1x10x128xf32>
    %11 = vector.broadcast %9 : vector<10x1x128xf32> to vector<10x10x128xf32>
    %12 = vector.broadcast %10 : vector<1x10x128xf32> to vector<10x10x128xf32>
    %13 = arith.mulf %11, %12 : vector<10x10x128xf32>
    %cst_3 = arith.constant 0.000000e+00 : f32
    %14 = vector.broadcast %cst_3 : f32 to vector<10x128xf32>
    %15 = arith.cmpf oge, %8, %14 : vector<10x128xf32>
    %16 = vector.shape_cast %2 : vector<1x128xf32> to vector<1x128xf32>
    %17 = vector.broadcast %16 : vector<1x128xf32> to vector<10x128xf32>
    %18 = vector.shape_cast %4 : vector<1x128xf32> to vector<1x128xf32>
    %19 = vector.broadcast %18 : vector<1x128xf32> to vector<10x128xf32>
    %20 = arith.select %15, %17, %19 : vector<10x128xi1>, vector<10x128xf32>
    %21 = arith.mulf %8, %20 : vector<10x128xf32>
    %22 = vector.shape_cast %21 : vector<10x128xf32> to vector<1x10x128xf32>
    %23 = vector.broadcast %22 : vector<1x10x128xf32> to vector<10x10x128xf32>
    %24 = arith.subf %13, %23 : vector<10x10x128xf32>
    %25 = math.exp %24 : vector<10x10x128xf32>
    %cst_4 = arith.constant dense<0.000000e+00> : vector<10x128xf32>
    %26 = vector.multi_reduction <add>, %25, %cst_4 [0] : vector<10x10x128xf32> to vector<10x128xf32>
    %27 = tpu.reciprocal %26 {approx = true} : vector<10x128xf32> -> vector<10x128xf32>
    %28 = arith.mulf %0, %27 : vector<10x128xf32>
    %29 = vector.shape_cast %28 : vector<10x128xf32> to vector<1x10x128xf32>
    %30 = vector.broadcast %29 : vector<1x10x128xf32> to vector<10x10x128xf32>
    %31 = arith.mulf %25, %30 : vector<10x10x128xf32>
    %cst_5 = arith.constant dense<0.000000e+00> : vector<10x128xf32>
    %32 = vector.multi_reduction <add>, %31, %cst_5 [1] : vector<10x10x128xf32> to vector<10x128xf32>
    %33 = vector.broadcast %6 : f32 to vector<10x128xf32>
    %34 = arith.mulf %33, %32 : vector<10x128xf32>
    %c1 = arith.constant 1 : index
    %35 = memref.load %arg1[%c1] : memref<8xf32, #tpu.memory_space<smem>>
    %c3 = arith.constant 3 : index
    %36 = memref.load %arg1[%c3] : memref<8xf32, #tpu.memory_space<smem>>
    %37 = vector.broadcast %35 : f32 to vector<10x128xf32>
    %38 = arith.mulf %0, %37 : vector<10x128xf32>
    %39 = vector.shape_cast %38 : vector<10x128xf32> to vector<10x1x128xf32>
    %40 = vector.shape_cast %0 : vector<10x128xf32> to vector<1x10x128xf32>
    %41 = vector.broadcast %39 : vector<10x1x128xf32> to vector<10x10x128xf32>
    %42 = vector.broadcast %40 : vector<1x10x128xf32> to vector<10x10x128xf32>
    %43 = arith.mulf %41, %42 : vector<10x10x128xf32>
    %cst_6 = arith.constant 0.000000e+00 : f32
    %44 = vector.broadcast %cst_6 : f32 to vector<10x128xf32>
    %45 = arith.cmpf oge, %38, %44 : vector<10x128xf32>
    %46 = vector.shape_cast %2 : vector<1x128xf32> to vector<1x128xf32>
    %47 = vector.broadcast %46 : vector<1x128xf32> to vector<10x128xf32>
    %48 = vector.shape_cast %4 : vector<1x128xf32> to vector<1x128xf32>
    %49 = vector.broadcast %48 : vector<1x128xf32> to vector<10x128xf32>
    %50 = arith.select %45, %47, %49 : vector<10x128xi1>, vector<10x128xf32>
    %51 = arith.mulf %38, %50 : vector<10x128xf32>
    %52 = vector.shape_cast %51 : vector<10x128xf32> to vector<1x10x128xf32>
    %53 = vector.broadcast %52 : vector<1x10x128xf32> to vector<10x10x128xf32>
    %54 = arith.subf %43, %53 : vector<10x10x128xf32>
    %55 = math.exp %54 : vector<10x10x128xf32>
    %cst_7 = arith.constant dense<0.000000e+00> : vector<10x128xf32>
    %56 = vector.multi_reduction <add>, %55, %cst_7 [0] : vector<10x10x128xf32> to vector<10x128xf32>
    %57 = tpu.reciprocal %56 {approx = true} : vector<10x128xf32> -> vector<10x128xf32>
    %58 = arith.mulf %0, %57 : vector<10x128xf32>
    %59 = vector.shape_cast %58 : vector<10x128xf32> to vector<1x10x128xf32>
    %60 = vector.broadcast %59 : vector<1x10x128xf32> to vector<10x10x128xf32>
    %61 = arith.mulf %55, %60 : vector<10x10x128xf32>
    %cst_8 = arith.constant dense<0.000000e+00> : vector<10x128xf32>
    %62 = vector.multi_reduction <add>, %61, %cst_8 [1] : vector<10x10x128xf32> to vector<10x128xf32>
    %63 = vector.broadcast %36 : f32 to vector<10x128xf32>
    %64 = arith.mulf %63, %62 : vector<10x128xf32>
    %65 = arith.addf %34, %64 : vector<10x128xf32>
    %c0_9 = arith.constant 0 : index
    %c0_10 = arith.constant 0 : index
    %66 = vector.load %arg3[%c0_9, %c0_10] : memref<128x10xf32, #tpu.memory_space<vmem>>, vector<128x10xf32>
    %cst_11 = arith.constant dense<0.000000e+00> : vector<128x128xf32>
    %67 = tpu.matmul %66, %65, %cst_11 {dimension_numbers = #tpu.dot_dimension_numbers<[1], [0], [0], [1], [0, 0, 1, 1], [], []>} : vector<128x10xf32>, vector<10x128xf32>, vector<128x128xf32> -> vector<128x128xf32>
    %c0_12 = arith.constant 0 : index
    %c0_13 = arith.constant 0 : index
    %68 = vector.load %arg4[%c0_12, %c0_13] : memref<128x1xf32, #tpu.memory_space<vmem>>, vector<128x1xf32>
    %69 = vector.broadcast %68 : vector<128x1xf32> to vector<128x128xf32>
    %70 = arith.addf %67, %69 : vector<128x128xf32>
    %cst_14 = arith.constant 0.000000e+00 : f32
    %71 = vector.broadcast %cst_14 : f32 to vector<128x128xf32>
    %72 = arith.maximumf %70, %71 : vector<128x128xf32>
    %c0_15 = arith.constant 0 : index
    %c0_16 = arith.constant 0 : index
    %73 = vector.load %arg5[%c0_15, %c0_16] : memref<10x128xf32, #tpu.memory_space<vmem>>, vector<10x128xf32>
    %cst_17 = arith.constant dense<0.000000e+00> : vector<10x128xf32>
    %74 = tpu.matmul %73, %72, %cst_17 {dimension_numbers = #tpu.dot_dimension_numbers<[1], [0], [0], [1], [0, 0, 1, 1], [], []>} : vector<10x128xf32>, vector<128x128xf32>, vector<10x128xf32> -> vector<10x128xf32>
    %c0_18 = arith.constant 0 : index
    %c0_19 = arith.constant 0 : index
    %75 = vector.load %arg6[%c0_18, %c0_19] : memref<10x1xf32, #tpu.memory_space<vmem>>, vector<10x1xf32>
    %76 = vector.broadcast %75 : vector<10x1xf32> to vector<10x128xf32>
    %77 = arith.addf %74, %76 : vector<10x128xf32>
    %cst_20 = arith.constant 0.000000e+00 : f32
    %78 = vector.broadcast %cst_20 : f32 to vector<10x128xf32>
    %79 = arith.maximumf %77, %78 : vector<10x128xf32>
    %cst_21 = arith.constant dense<0xFF800000> : vector<128xf32>
    %80 = vector.multi_reduction <maximumf>, %79, %cst_21 [0] : vector<10x128xf32> to vector<128xf32>
    %81 = vector.shape_cast %80 : vector<128xf32> to vector<1x128xf32>
    %cst_22 = arith.constant dense<0x7F800000> : vector<128xf32>
    %82 = vector.multi_reduction <minimumf>, %79, %cst_22 [0] : vector<10x128xf32> to vector<128xf32>
    %83 = vector.shape_cast %82 : vector<128xf32> to vector<1x128xf32>
    %c4 = arith.constant 4 : index
    %84 = memref.load %arg1[%c4] : memref<8xf32, #tpu.memory_space<smem>>
    %c6 = arith.constant 6 : index
    %85 = memref.load %arg1[%c6] : memref<8xf32, #tpu.memory_space<smem>>
    %86 = vector.broadcast %84 : f32 to vector<10x128xf32>
    %87 = arith.mulf %79, %86 : vector<10x128xf32>
    %88 = vector.shape_cast %87 : vector<10x128xf32> to vector<10x1x128xf32>
    %89 = vector.shape_cast %79 : vector<10x128xf32> to vector<1x10x128xf32>
    %90 = vector.broadcast %88 : vector<10x1x128xf32> to vector<10x10x128xf32>
    %91 = vector.broadcast %89 : vector<1x10x128xf32> to vector<10x10x128xf32>
    %92 = arith.mulf %90, %91 : vector<10x10x128xf32>
    %cst_23 = arith.constant 0.000000e+00 : f32
    %93 = vector.broadcast %cst_23 : f32 to vector<10x128xf32>
    %94 = arith.cmpf oge, %87, %93 : vector<10x128xf32>
    %95 = vector.shape_cast %81 : vector<1x128xf32> to vector<1x128xf32>
    %96 = vector.broadcast %95 : vector<1x128xf32> to vector<10x128xf32>
    %97 = vector.shape_cast %83 : vector<1x128xf32> to vector<1x128xf32>
    %98 = vector.broadcast %97 : vector<1x128xf32> to vector<10x128xf32>
    %99 = arith.select %94, %96, %98 : vector<10x128xi1>, vector<10x128xf32>
    %100 = arith.mulf %87, %99 : vector<10x128xf32>
    %101 = vector.shape_cast %100 : vector<10x128xf32> to vector<1x10x128xf32>
    %102 = vector.broadcast %101 : vector<1x10x128xf32> to vector<10x10x128xf32>
    %103 = arith.subf %92, %102 : vector<10x10x128xf32>
    %104 = math.exp %103 : vector<10x10x128xf32>
    %cst_24 = arith.constant dense<0.000000e+00> : vector<10x128xf32>
    %105 = vector.multi_reduction <add>, %104, %cst_24 [0] : vector<10x10x128xf32> to vector<10x128xf32>
    %106 = tpu.reciprocal %105 {approx = true} : vector<10x128xf32> -> vector<10x128xf32>
    %107 = arith.mulf %79, %106 : vector<10x128xf32>
    %108 = vector.shape_cast %107 : vector<10x128xf32> to vector<1x10x128xf32>
    %109 = vector.broadcast %108 : vector<1x10x128xf32> to vector<10x10x128xf32>
    %110 = arith.mulf %104, %109 : vector<10x10x128xf32>
    %cst_25 = arith.constant dense<0.000000e+00> : vector<10x128xf32>
    %111 = vector.multi_reduction <add>, %110, %cst_25 [1] : vector<10x10x128xf32> to vector<10x128xf32>
    %112 = vector.broadcast %85 : f32 to vector<10x128xf32>
    %113 = arith.mulf %112, %111 : vector<10x128xf32>
    %c5 = arith.constant 5 : index
    %114 = memref.load %arg1[%c5] : memref<8xf32, #tpu.memory_space<smem>>
    %c7 = arith.constant 7 : index
    %115 = memref.load %arg1[%c7] : memref<8xf32, #tpu.memory_space<smem>>
    %116 = vector.broadcast %114 : f32 to vector<10x128xf32>
    %117 = arith.mulf %79, %116 : vector<10x128xf32>
    %118 = vector.shape_cast %117 : vector<10x128xf32> to vector<10x1x128xf32>
    %119 = vector.shape_cast %79 : vector<10x128xf32> to vector<1x10x128xf32>
    %120 = vector.broadcast %118 : vector<10x1x128xf32> to vector<10x10x128xf32>
    %121 = vector.broadcast %119 : vector<1x10x128xf32> to vector<10x10x128xf32>
    %122 = arith.mulf %120, %121 : vector<10x10x128xf32>
    %cst_26 = arith.constant 0.000000e+00 : f32
    %123 = vector.broadcast %cst_26 : f32 to vector<10x128xf32>
    %124 = arith.cmpf oge, %117, %123 : vector<10x128xf32>
    %125 = vector.shape_cast %81 : vector<1x128xf32> to vector<1x128xf32>
    %126 = vector.broadcast %125 : vector<1x128xf32> to vector<10x128xf32>
    %127 = vector.shape_cast %83 : vector<1x128xf32> to vector<1x128xf32>
    %128 = vector.broadcast %127 : vector<1x128xf32> to vector<10x128xf32>
    %129 = arith.select %124, %126, %128 : vector<10x128xi1>, vector<10x128xf32>
    %130 = arith.mulf %117, %129 : vector<10x128xf32>
    %131 = vector.shape_cast %130 : vector<10x128xf32> to vector<1x10x128xf32>
    %132 = vector.broadcast %131 : vector<1x10x128xf32> to vector<10x10x128xf32>
    %133 = arith.subf %122, %132 : vector<10x10x128xf32>
    %134 = math.exp %133 : vector<10x10x128xf32>
    %cst_27 = arith.constant dense<0.000000e+00> : vector<10x128xf32>
    %135 = vector.multi_reduction <add>, %134, %cst_27 [0] : vector<10x10x128xf32> to vector<10x128xf32>
    %136 = tpu.reciprocal %135 {approx = true} : vector<10x128xf32> -> vector<10x128xf32>
    %137 = arith.mulf %79, %136 : vector<10x128xf32>
    %138 = vector.shape_cast %137 : vector<10x128xf32> to vector<1x10x128xf32>
    %139 = vector.broadcast %138 : vector<1x10x128xf32> to vector<10x10x128xf32>
    %140 = arith.mulf %134, %139 : vector<10x10x128xf32>
    %cst_28 = arith.constant dense<0.000000e+00> : vector<10x128xf32>
    %141 = vector.multi_reduction <add>, %140, %cst_28 [1] : vector<10x10x128xf32> to vector<10x128xf32>
    %142 = vector.broadcast %115 : f32 to vector<10x128xf32>
    %143 = arith.mulf %142, %141 : vector<10x128xf32>
    %144 = arith.addf %113, %143 : vector<10x128xf32>
    %145 = arith.truncf %144 : vector<10x128xf32> to vector<10x128xbf16>
    %c0_29 = arith.constant 0 : index
    %c0_30 = arith.constant 0 : index
    %146 = vector.load %arg7[%c0_29, %c0_30] : memref<128x10xbf16, #tpu.memory_space<vmem>>, vector<128x10xbf16>
    %cst_31 = arith.constant dense<0.000000e+00> : vector<128x128xf32>
    %147 = tpu.matmul %146, %145, %cst_31 {dimension_numbers = #tpu.dot_dimension_numbers<[1], [0], [0], [1], [0, 0, 1, 1], [], []>} : vector<128x10xbf16>, vector<10x128xbf16>, vector<128x128xf32> -> vector<128x128xf32>
    %c0_32 = arith.constant 0 : index
    %c0_33 = arith.constant 0 : index
    %148 = vector.load %arg8[%c0_32, %c0_33] : memref<128x1xf32, #tpu.memory_space<vmem>>, vector<128x1xf32>
    %149 = vector.broadcast %148 : vector<128x1xf32> to vector<128x128xf32>
    %150 = arith.addf %147, %149 : vector<128x128xf32>
    %cst_34 = arith.constant 0.000000e+00 : f32
    %151 = vector.broadcast %cst_34 : f32 to vector<128x128xf32>
    %152 = arith.maximumf %150, %151 : vector<128x128xf32>
    %153 = arith.truncf %152 : vector<128x128xf32> to vector<128x128xbf16>
    %c0_35 = arith.constant 0 : index
    %c0_36 = arith.constant 0 : index
    %154 = vector.load %arg9[%c0_35, %c0_36] : memref<256x128xbf16, #tpu.memory_space<vmem>>, vector<256x128xbf16>
    %cst_37 = arith.constant dense<0.000000e+00> : vector<256x128xf32>
    %155 = tpu.matmul %154, %153, %cst_37 {dimension_numbers = #tpu.dot_dimension_numbers<[1], [0], [0], [1], [0, 0, 1, 1], [], []>} : vector<256x128xbf16>, vector<128x128xbf16>, vector<256x128xf32> -> vector<256x128xf32>
    %c0_38 = arith.constant 0 : index
    %c0_39 = arith.constant 0 : index
    %156 = vector.load %arg10[%c0_38, %c0_39] : memref<256x1xf32, #tpu.memory_space<vmem>>, vector<256x1xf32>
    %157 = vector.broadcast %156 : vector<256x1xf32> to vector<256x128xf32>
    %158 = arith.addf %155, %157 : vector<256x128xf32>
    %cst_40 = arith.constant 0.000000e+00 : f32
    %159 = vector.broadcast %cst_40 : f32 to vector<256x128xf32>
    %160 = arith.maximumf %158, %159 : vector<256x128xf32>
    %c0_41 = arith.constant 0 : index
    %c0_42 = arith.constant 0 : index
    %161 = vector.load %arg11[%c0_41, %c0_42] : memref<2x256xbf16, #tpu.memory_space<vmem>>, vector<2x256xbf16>
    %162 = arith.truncf %160 : vector<256x128xf32> to vector<256x128xbf16>
    %cst_43 = arith.constant dense<0.000000e+00> : vector<2x128xf32>
    %163 = tpu.matmul %161, %162, %cst_43 {dimension_numbers = #tpu.dot_dimension_numbers<[1], [0], [0], [1], [0, 0, 1, 1], [], []>} : vector<2x256xbf16>, vector<256x128xbf16>, vector<2x128xf32> -> vector<2x128xf32>
    %c0_44 = arith.constant 0 : index
    %c0_45 = arith.constant 0 : index
    %164 = vector.load %arg12[%c0_44, %c0_45] : memref<2x1xf32, #tpu.memory_space<vmem>>, vector<2x1xf32>
    %165 = vector.broadcast %164 : vector<2x1xf32> to vector<2x128xf32>
    %166 = arith.addf %163, %165 : vector<2x128xf32>
    %c0_46 = arith.constant 0 : index
    %c0_47 = arith.constant 0 : index
    %167 = vector.load %arg13[%c0_46, %c0_47] : memref<2x128xf32, #tpu.memory_space<vmem>>, vector<2x128xf32>
    tpu.vector_store %arg13[%c0_46, %c0_47], %166 {strides = array<i32>} : memref<2x128xf32, #tpu.memory_space<vmem>>, vector<2x128xf32>,
    return
  }
  func.func @transform_0(%arg0: i32) -> i32 {
    %c0_i32 = arith.constant 0 : i32
    %c0_i32_0 = arith.constant 0 : i32
    return %c0_i32 : i32
  }
  func.func @transform_1(%arg0: i32) -> (i32, i32) {
    %c0_i32 = arith.constant 0 : i32
    %c0_i32_0 = arith.constant 0 : i32
    return %c0_i32, %arg0 : i32, i32
  }
  func.func @transform_2(%arg0: i32) -> (i32, i32) {
    %c0_i32 = arith.constant 0 : i32
    %c0_i32_0 = arith.constant 0 : i32
    %c0_i32_1 = arith.constant 0 : i32
    return %c0_i32, %c0_i32_0 : i32, i32
  }
  func.func @transform_3(%arg0: i32) -> (i32, i32) {
    %c0_i32 = arith.constant 0 : i32
    %c0_i32_0 = arith.constant 0 : i32
    %c0_i32_1 = arith.constant 0 : i32
    return %c0_i32, %c0_i32_0 : i32, i32
  }
  func.func @transform_4(%arg0: i32) -> (i32, i32) {
    %c0_i32 = arith.constant 0 : i32
    %c0_i32_0 = arith.constant 0 : i32
    %c0_i32_1 = arith.constant 0 : i32
    return %c0_i32, %c0_i32_0 : i32, i32
  }
  func.func @transform_5(%arg0: i32) -> (i32, i32) {
    %c0_i32 = arith.constant 0 : i32
    %c0_i32_0 = arith.constant 0 : i32
    %c0_i32_1 = arith.constant 0 : i32
    return %c0_i32, %c0_i32_0 : i32, i32
  }
  func.func @transform_6(%arg0: i32) -> (i32, i32) {
    %c0_i32 = arith.constant 0 : i32
    %c0_i32_0 = arith.constant 0 : i32
    %c0_i32_1 = arith.constant 0 : i32
    return %c0_i32, %c0_i32_0 : i32, i32
  }
  func.func @transform_7(%arg0: i32) -> (i32, i32) {
    %c0_i32 = arith.constant 0 : i32
    %c0_i32_0 = arith.constant 0 : i32
    %c0_i32_1 = arith.constant 0 : i32
    return %c0_i32, %c0_i32_0 : i32, i32
  }
  func.func @transform_8(%arg0: i32) -> (i32, i32) {
    %c0_i32 = arith.constant 0 : i32
    %c0_i32_0 = arith.constant 0 : i32
    %c0_i32_1 = arith.constant 0 : i32
    return %c0_i32, %c0_i32_0 : i32, i32
  }
  func.func @transform_9(%arg0: i32) -> (i32, i32) {
    %c0_i32 = arith.constant 0 : i32
    %c0_i32_0 = arith.constant 0 : i32
    %c0_i32_1 = arith.constant 0 : i32
    return %c0_i32, %c0_i32_0 : i32, i32
  }
  func.func @transform_10(%arg0: i32) -> (i32, i32) {
    %c0_i32 = arith.constant 0 : i32
    %c0_i32_0 = arith.constant 0 : i32
    %c0_i32_1 = arith.constant 0 : i32
    return %c0_i32, %c0_i32_0 : i32, i32
  }
  func.func @transform_11(%arg0: i32) -> (i32, i32) {
    %c0_i32 = arith.constant 0 : i32
    %c0_i32_0 = arith.constant 0 : i32
    %c0_i32_1 = arith.constant 0 : i32
    return %c0_i32, %c0_i32_0 : i32, i32
  }
  func.func @transform_12(%arg0: i32) -> (i32, i32) {
    %c0_i32 = arith.constant 0 : i32
    %c0_i32_0 = arith.constant 0 : i32
    return %c0_i32, %arg0 : i32, i32
  }
}

</mosaic_0001>

<bundles_post_ra>
// kernel: tpu_custom_call.1
= control target key start
LH: loop header
LB: loop body
LE: loop exit
PB: predicated region body
PF: predicated region fallthrough
CT: control target
= control target key end

     0   :  { %17 = vsyncpa [#allocation4], 0  ;;  %s5061_s0 = inlined_call_operand.vmem [shape: f32[8], index: 0, kind: input, shape index: {}]   ;;  %s5062_s1 = inlined_call_operand.vmem [shape: f32[10,128], index: 1, kind: input, shape index: {}]   ;;  %s5063_s2 = inlined_call_operand.vmem [shape: f32[128,10], index: 2, kind: input, shape index: {}]   ;;  %s5064_s3 = inlined_call_operand.vmem [shape: f32[128,1], index: 3, kind: input, shape index: {}]   ;;  %s5065_s4 = inlined_call_operand.vmem [shape: f32[10,128], index: 4, kind: input, shape index: {}]   ;;  %s5066_s5 = inlined_call_operand.vmem [shape: f32[10,1], index: 5, kind: input, shape index: {}]   ;;  %s5067_s6 = inlined_call_operand.vmem [shape: bf16[128,10], index: 6, kind: input, shape index: {}]   ;;  %s5068_s7 = inlined_call_operand.vmem [shape: f32[128,1], index: 7, kind: input, shape index: {}]   ;;  %s5069_s8 = inlined_call_operand.vmem [shape: bf16[256,128], index: 8, kind: input, shape index: {}]   ;;  %s5070_s9 = inlined_call_operand.vmem [shape: f32[256,1], index: 9, kind: input, shape index: {}]   ;;  %s5071_s10 = inlined_call_operand.vmem [shape: bf16[2,256], index: 10, kind: input, shape index: {}]   ;;  %s5072_s11 = inlined_call_operand.vmem [shape: f32[2,1], index: 11, kind: input, shape index: {}]   ;;  %s5073_s12 = inlined_call_operand.hbm [shape: f32[2,128], index: 12, kind: output, shape index: {}]  }
   0x1   :  { %18 = vsyncpa [#allocation3], 0  ;;  %s25_s23 = sshll.u32 %s5061_s0, 4  ;;  %s26_s23 = int_to_ptr.vmem [resolvable:$true] %s25_s23 }
   0x2   :  { %s3423_s24 = scalar_lea.vmem %s26_s23, 16  ;;  %p3428_p1 = scmp.lt.s32.totalorder %s26_s23, %s26_s23 }
   0x3   :  { %p3424_p0 = scmp.ne.s32.totalorder %s26_s23, %s3423_s24  ;;  %p3429_p2 = scmp.lt.s32.totalorder %s3423_s24, %s3423_s24 }
   0x5   :  { %p3430_p3 = por %p3429_p2, %p3428_p1 }
   0x7   :  { %p3431_p4 = pnand %p3430_p3, %p3424_p0 }
   0x9   :  { %3434 = shalt.err (!%p3431_p4)
}
   0xa   :  { %s3459_s25 = smov [#allocation2]  }
   0xb   :  { %28 = dma.vmem_to_smem %s26_s23, 16, %s3459_s25, [#allocation4]  }
   0xc   :  { %3455 = dma.done.wait [#allocation4], 16  }
   0xd   :  { %3456 = vsyncadd [#allocation4], 4294967280 }
   0xe   :  { %54 = sfence }
   0xf   :  { %v830_v0 = vld [vmem:[%s5064_s3 + $0x78] sm:$0xff]  ;;  %v828_v1 = vld [vmem:[%s5064_s3 + $0x68] sm:$0xff]  ;;  %v86_v2 = vlaneseq  ;;  %v3460_v3 = vmov 0   ;;  %s3537_s0 = sld [smem:[#allocation2]]  ;;  %v829_v4 = vld [vmem:[%s5064_s3 + $0x70] sm:$0xff]  ;;  %vm58_vm0 = vcmask 1041408  }
  0x10   :  { %3219 = vset.pattern.permute.xlu0 %v3460_v3  ;;  %3220 = vset.pattern.permute.xlu1 %v3460_v3  ;;  %v827_v5 = vld [vmem:[%s5064_s3 + $0x60] sm:$0xff]  ;;  %v3461_v6 = vmov 1966171168   ;;  %v3553_v10 = vld [vmem:[%s5062_s1 + $0x8] sm:$0x3]  ;;  %v826_v11 = vld [vmem:[%s5064_s3 + $0x58] sm:$0xff] }
  0x11   :  { %908 = vperm.xlu0 %3219, %v830_v0   ;;  %898 = vperm.xlu1 %3220, %v828_v1   ;;  %v84_v7 = vunpack.c.l.s4 %v3461_v6  ;;  %v87_v8 = vshrl.u32 %v86_v2, 7  ;;  %v3548_v9 = vld [vmem:[%s5062_s1] sm:$0xff]  ;;  %v825_v12 = vld [vmem:[%s5064_s3 + $0x50] sm:$0xff]  ;;  %v59_v13 = vsel %vm58_vm0, %v3553_v10, -inf  ;;  %v67_v14 = vsel %vm58_vm0, %v3553_v10, inf  ;;  %v824_v21 = vld [vmem:[%s5064_s3 + $0x48] sm:$0xff] }
  0x12   :  { %v60_v16 = vmax.f32 %v3548_v9, %v59_v13  ;;  %v68_v17 = vmin.f32 %v3548_v9, %v67_v14  ;;  %v823_v24 = vld [vmem:[%s5064_s3 + $0x40] sm:$0xff]  ;;  %s3585_s28 = sld [smem:[#allocation2 + $0x1]]  ;;  %v822_v30 = vld [vmem:[%s5064_s3 + $0x38] sm:$0xff]  ;;  %v821_v31 = vld [vmem:[%s5064_s3 + $0x30] sm:$0xff]  ;;  %vm937_vm5 = vcmask 80896   ;;  %vm921_vm6 = vcmask 1041409  }
  0x13   :  { %v85_v15 = vunpack.c.0.s8 %v84_v7  ;;  %v3579_v25 = vsub.s32 0, %v87_v8  ;;  %v820_v40 = vld [vmem:[%s5064_s3 + $0x28] sm:$0xff]  ;;  %v819_v41 = vld [vmem:[%s5064_s3 + $0x20] sm:$0xff]  ;;  %v818_v48 = vld [vmem:[%s5064_s3 + $0x18] sm:$0xff]  ;;  %s4130_s14 = sld [smem:[#allocation2 + $0x2]]  ;;  %vm923_vm7 = vcmask 1042434  }
  0x14   :  { %v61_v22 = vrot.slane %v60_v16, 4  ;;  %v69_v23 = vrot.slane %v68_v17, 4  ;;  %v817_v49 = vld [vmem:[%s5064_s3 + $0x10] sm:$0xff]  ;;  %s4142_s19 = sld [smem:[#allocation2 + $0x3]]  ;;  %vm925_vm8 = vcmask 1043459   ;;  %vm927_vm9 = vcmask 1044484  }
  0x15   :  { %903 = vperm.xlu0 %3219, %v829_v4   ;;  %893 = vperm.xlu1 %3220, %v827_v5   ;;  %v77_v18 = vstv %s3537_s0  ;;  %v3571_v20 = vsub.s32 %v85_v15, %v87_v8  ;;  %v816_v5 = vld [vmem:[%s5064_s3 + $0x8] sm:$0xff]  ;;  %vm929_vm10 = vcmask 1045509   ;;  %vm931_vm11 = vcmask 1046534   ;;  %s4402_s13 = sld [smem:[#allocation2 + $0x4]] }
  0x16   :  { %v3569_v19 = vmul.f32 %v77_v18, %v3548_v9  ;;  %v62_v26 = vmax.f32 %v60_v16, %v61_v22  ;;  %v70_v27 = vmin.f32 %v68_v17, %v69_v23  ;;  %v79_v34 = vmul.f32 %v77_v18, %v3553_v10 }
  0x17   :  { %vm933_vm12 = vcmask 1047559  }
  0x18   :  { %v82_v28 = vcombine.high %v3569_v19, %v3569_v19  ;;  %v89_v29 = vrot.slane %v3569_v19, %v3571_v20  ;;  %v63_v32 = vrot.slane %v62_v26, 2  ;;  %v71_v33 = vrot.slane %v70_v27, 2 }
  0x19   :  { %888 = vperm.xlu0 %3219, %v826_v11   ;;  %883 = vperm.xlu1 %3220, %v825_v12   ;;  %v137_v39 = vrot.slane %v79_v34, %v3571_v20  ;;  %vm223_vm1 = vcmp.ge.f32.partialorder %v3569_v19, 0.0  ;;  %vm224_vm2 = vcmp.ge.f32.partialorder %v79_v34, 0.0  ;;  %v434_v61 = vstv %s3585_s28 }
  0x1a   :  { %v64_v35 = vmax.f32 %v62_v26, %v63_v32  ;;  %v72_v36 = vmin.f32 %v70_v27, %v71_v33  ;;  %v96_v37 = vrot.slane %v82_v28, %v3571_v20  ;;  %v97_v38 = vcombine.high %v89_v29, %v89_v29  ;;  %v1152_v26 = vld [vmem:[%s5066_s5 + $0x8] sm:$0x3] }
  0x1b   :  { %v105_v42 = vrot.slane %v89_v29, %v3571_v20  ;;  %v138_v47 = vcombine.high %v137_v39, %v137_v39  ;;  %v145_v59 = vrot.slane %v137_v39, %v3571_v20  ;;  %v3649_v15 = vmul.f32 %v434_v61, %v3548_v9 }
  0x1c   :  { %v65_v43 = vrot.slane %v64_v35, 1  ;;  %v73_v44 = vrot.slane %v72_v36, 1  ;;  %v98_v45 = vcombine.high %v96_v37, %v96_v37  ;;  %v119_v46 = vrot.slane %v97_v38, %v3571_v20 }
  0x1d   :  { %878 = vperm.xlu0 %3219, %v824_v21   ;;  %873 = vperm.xlu1 %3220, %v823_v24   ;;  %v127_v50 = vcombine.high %v105_v42, %v105_v42  ;;  %v156_v51 = vrot.slane %v105_v42, %v3579_v25  ;;  %v112_v54 = vrot.slane %v96_v37, %v3571_v20  ;;  %vm580_vm3 = vcmp.ge.f32.partialorder %v3649_v15, 0.0 }
  0x1e   :  { %v3612_v52 = vmax.f32 %v64_v35, %v65_v43  ;;  %v3614_v53 = vmin.f32 %v72_v36, %v73_v44  ;;  %v126_v55 = vrot.slane %v98_v45, %v3571_v20  ;;  %v129_v56 = vcombine.high %v119_v46, %v119_v46 }
  0x1f   :  { %v160_v57 = vrot.slane %v119_v46, %v3579_v25  ;;  %v128_v58 = vcombine.high %v112_v54, %v112_v54  ;;  %v152_v60 = vrot.slane %v138_v47, %v3571_v20  ;;  %v164_v63 = vrot.slane %v127_v50, %v3579_v25 }
  0x20   :  { %v130_v62 = vcombine.high %v126_v55, %v126_v55  ;;  %v203_v0 = vmul.f32 %v156_v51, %v3548_v9  ;;  %v204_v1 = vmul.f32 %v156_v51, %v3553_v10  ;;  %v225_v3 = vsel %vm223_vm1, %v3612_v52, %v3614_v53 }
  0x21   :  { %868 = vperm.xlu0 %3219, %v822_v30   ;;  %863 = vperm.xlu1 %3220, %v821_v31   ;;  %v205_v2 = vmul.f32 %v160_v57, %v3548_v9  ;;  %v226_v4 = vsel %vm224_vm2, %v3612_v52, %v3614_v53  ;;  %v168_v6 = vrot.slane %v129_v56, %v3579_v25 }
  0x22   :  { %v206_v7 = vmul.f32 %v160_v57, %v3553_v10  ;;  %v3639_v8 = vmul.f32 %v225_v3, %v3569_v19  ;;  %v3641_v11 = vmul.f32 %v226_v4, %v79_v34  ;;  %v172_v12 = vrot.slane %v112_v54, %v3579_v25 }
  0x23   :  { %v176_v13 = vrot.slane %v126_v55, %v3579_v25  ;;  %v207_v14 = vmul.f32 %v164_v63, %v3548_v9  ;;  %v180_v16 = vrot.slane %v128_v58, %v3579_v25  ;;  %v184_v17 = vrot.slane %v130_v62, %v3579_v25 }
  0x24   :  { %v188_v18 = vrot.slane %v145_v59, %v3579_v25  ;;  %v208_v19 = vmul.f32 %v164_v63, %v3553_v10  ;;  %v209_v21 = vmul.f32 %v168_v6, %v3548_v9  ;;  %v229_v22 = vsub.f32 %v203_v0, %v3639_v8 }
  0x25   :  { %858 = vperm.xlu0 %3219, %v820_v40   ;;  %853 = vperm.xlu1 %3220, %v819_v41   ;;  %v230_v23 = vsub.f32 %v204_v1, %v3641_v11  ;;  %v231_v24 = vsub.f32 %v205_v2, %v3639_v8  ;;  %v192_v27 = vrot.slane %v152_v60, %v3579_v25 }
  0x26   :  { %v210_v28 = vmul.f32 %v168_v6, %v3553_v10  ;;  %v211_v29 = vmul.f32 %v172_v12, %v3548_v9  ;;  %v232_v30 = vsub.f32 %v206_v7, %v3641_v11  ;;  %v212_v31 = vmul.f32 %v172_v12, %v3553_v10 }
  0x27   :  { %v213_v32 = vmul.f32 %v176_v13, %v3548_v9  ;;  %v214_v33 = vmul.f32 %v176_v13, %v3553_v10  ;;  %v233_v34 = vsub.f32 %v207_v14, %v3639_v8  ;;  %v215_v35 = vmul.f32 %v180_v16, %v3548_v9  ;;  %v2020_v13 = vld [vmem:[%s5068_s7 + $0x70] sm:$0xff]  ;;  %v815_v14 = vld [vmem:[%s5064_s3] sm:$0xff] }
  0x28   :  { %v216_v36 = vmul.f32 %v180_v16, %v3553_v10  ;;  %v217_v37 = vmul.f32 %v184_v17, %v3548_v9  ;;  %v234_v38 = vsub.f32 %v208_v19, %v3641_v11  ;;  %v235_v39 = vsub.f32 %v209_v21, %v3639_v8 }
  0x29   :  { %848 = vperm.xlu0 %3219, %v818_v48   ;;  %843 = vperm.xlu1 %3220, %v817_v49   ;;  %v249_v40 = vmul.f32 1.442695, %v229_v22  ;;  %v251_v41 = vmul.f32 1.442695, %v230_v23  ;;  %v253_v42 = vmul.f32 1.442695, %v231_v24  ;;  %v218_v43 = vmul.f32 %v184_v17, %v3553_v10 }
  0x2a   :  { %v219_v44 = vmul.f32 %v188_v18, %v3548_v9  ;;  %v236_v45 = vsub.f32 %v210_v28, %v3641_v11  ;;  %v255_v46 = vmul.f32 1.442695, %v232_v30  ;;  %v220_v47 = vmul.f32 %v188_v18, %v3553_v10  ;;  %v2018_v23 = vld [vmem:[%s5068_s7 + $0x60] sm:$0xff] }
  0x2b   :  { %v237_v48 = vsub.f32 %v211_v29, %v3639_v8  ;;  %3245 = vpow2.f32 %v249_v40  ;;  %v257_v49 = vmul.f32 1.442695, %v233_v34  ;;  %v221_v50 = vmul.f32 %v192_v27, %v3548_v9  ;;  %v1151_v24 = vld [vmem:[%s5066_s5] sm:$0xff] }
  0x2c   :  { %v238_v51 = vsub.f32 %v212_v31, %v3641_v11  ;;  %3247 = vpow2.f32 %v251_v41  ;;  %v259_v54 = vmul.f32 1.442695, %v234_v38  ;;  %v239_v55 = vsub.f32 %v213_v32, %v3639_v8 }
  0x2d   :  { %838 = vperm.xlu0 %3219, %v816_v5   ;;  %3249 = vpow2.f32 %v253_v42  ;;  %v261_v56 = vmul.f32 1.442695, %v235_v39  ;;  %v439_v57 = vcombine.high %v3649_v15, %v3649_v15  ;;  %v222_v58 = vmul.f32 %v192_v27, %v3553_v10  ;;  %833 = vperm.xlu1 %3220, %v815_v14  }
  0x2e   :  { %v240_v59 = vsub.f32 %v214_v33, %v3641_v11  ;;  %3251 = vpow2.f32 %v255_v46  ;;  %v263_v60 = vmul.f32 1.442695, %v236_v45  ;;  %v241_v62 = vsub.f32 %v215_v35, %v3639_v8 }
  0x2f   :  { %3253 = vpow2.f32 %v257_v49  ;;  %v265_v63 = vmul.f32 1.442695, %v237_v48  ;;  %v3692_v0 = vmul.f32 %v434_v61, %v3553_v10  ;;  %v242_v1 = vsub.f32 %v216_v36, %v3641_v11  ;;  %v2016_v36 = vld [vmem:[%s5068_s7 + $0x50] sm:$0xff] }
  0x30   :  { %3255 = vpow2.f32 %v259_v54  ;;  %v267_v2 = vmul.f32 1.442695, %v238_v51  ;;  %v446_v3 = vrot.slane %v3649_v15, %v3571_v20  ;;  %v243_v4 = vsub.f32 %v217_v37, %v3639_v8  ;;  %v2021_v37 = vld [vmem:[%s5068_s7 + $0x78] sm:$0xff] }
  0x31   :  { %1160 = vperm.xlu0 %3219, %v1152_v26   ;;  %3257 = vpow2.f32 %v261_v56  ;;  %v269_v5 = vmul.f32 1.442695, %v239_v55  ;;  %v453_v6 = vrot.slane %v439_v57, %v3571_v20  ;;  %v244_v7 = vsub.f32 %v218_v43, %v3641_v11  ;;  %1155 = vperm.xlu1 %3220, %v1151_v24   ;;  %v2014_v56 = vld [vmem:[%s5068_s7 + $0x40] sm:$0xff] }
  0x32   :  { %3259 = vpow2.f32 %v263_v60  ;;  %v271_v12 = vmul.f32 1.442695, %v240_v59  ;;  %v3702_v61 = vrot.slane %v3692_v0, %v3571_v20  ;;  %v245_v16 = vsub.f32 %v219_v44, %v3639_v8 }
  0x33   :  { %v246_v17 = vsub.f32 %v220_v47, %v3641_v11  ;;  %3261 = vpow2.f32 %v265_v63  ;;  %v273_v18 = vmul.f32 1.442695, %v241_v62  ;;  %v247_v19 = vsub.f32 %v221_v50, %v3639_v8  ;;  %v2019_v62 = vld [vmem:[%s5068_s7 + $0x68] sm:$0xff] }
  0x34   :  { %v248_v21 = vsub.f32 %v222_v58, %v3641_v11  ;;  %3263 = vpow2.f32 %v267_v2  ;;  %v275_v22 = vmul.f32 1.442695, %v242_v1  ;;  %v277_v26 = vmul.f32 1.442695, %v243_v4 }
  0x35   :  { %2094 = vperm.xlu0 %3219, %v2020_v13   ;;  %3265 = vpow2.f32 %v269_v5  ;;  %v454_v27 = vcombine.high %v446_v3, %v446_v3  ;;  %v455_v28 = vcombine.high %v453_v6, %v453_v6  ;;  %v279_v29 = vmul.f32 1.442695, %v244_v7  ;;  %2099 = vperm.xlu1 %3220, %v2021_v37   ;;  %v2010_v37 = vld [vmem:[%s5068_s7 + $0x20] sm:$0xff] }
  0x36   :  { %3267 = vpow2.f32 %v271_v12  ;;  %v462_v8 = vrot.slane %v446_v3, %v3571_v20  ;;  %vm581_vm4 = vcmp.ge.f32.partialorder %v3692_v0, 0.0  ;;  %v281_v11 = vmul.f32 1.442695, %v245_v16 }
  0x37   :  { %3269 = vpow2.f32 %v273_v18  ;;  %v283_v30 = vmul.f32 1.442695, %v246_v17  ;;  %v3726_v31 = vsel %vm580_vm3, %v3612_v52, %v3614_v53  ;;  %v285_v33 = vmul.f32 1.442695, %v247_v19  ;;  %v2012_v18 = vld [vmem:[%s5068_s7 + $0x30] sm:$0xff] }
  0x38   :  { %v3728_v32 = vpop.eup %3245  ;;  %3271 = vpow2.f32 %v275_v22  ;;  %v287_v34 = vmul.f32 1.442695, %v248_v21  ;;  %v495_v35 = vcombine.high %v3702_v61, %v3702_v61  ;;  %v469_v39 = vrot.slane %v453_v6, %v3571_v20 }
  0x39   :  { %2084 = vperm.xlu0 %3219, %v2018_v23   ;;  %v3738_v38 = vpop.eup %3247  ;;  %3273 = vpow2.f32 %v277_v26  ;;  %v476_v40 = vrot.slane %v454_v27, %v3571_v20  ;;  %v483_v41 = vrot.slane %v455_v28, %v3571_v20  ;;  %v484_v44 = vcombine.high %v462_v8, %v462_v8  ;;  %2089 = vperm.xlu1 %3220, %v2019_v62   ;;  %v2017_v26 = vld [vmem:[%s5068_s7 + $0x58] sm:$0xff] }
  0x3a   :  { %v3743_v42 = vpop.eup %3249  ;;  %3275 = vpow2.f32 %v279_v29  ;;  %v298_v43 = vsel %vm58_vm0, %v3738_v38, 0.0  ;;  %v502_v45 = vrot.slane %v3702_v61, %v3571_v20  ;;  %v485_v48 = vcombine.high %v469_v39, %v469_v39 }
  0x3b   :  { %v3749_v46 = vpop.eup %3251  ;;  %3277 = vpow2.f32 %v281_v11  ;;  %v289_v47 = vadd.f32 %v3743_v42, %v3728_v32  ;;  %v486_v49 = vcombine.high %v476_v40, %v476_v40  ;;  %v487_v54 = vcombine.high %v483_v41, %v483_v41 }
  0x3c   :  { %v3753_v50 = vpop.eup %3253  ;;  %3279 = vpow2.f32 %v283_v30  ;;  %v299_v51 = vsel %vm58_vm0, %v3749_v46, 0.0  ;;  %v509_v55 = vrot.slane %v495_v35, %v3571_v20  ;;  %v513_v60 = vrot.slane %v462_v8, %v3579_v25 }
  0x3d   :  { %2074 = vperm.xlu0 %3219, %v2016_v36   ;;  %v3761_v57 = vpop.eup %3255  ;;  %3281 = vpow2.f32 %v285_v33  ;;  %v290_v58 = vadd.f32 %v3753_v50, %v289_v47  ;;  %v300_v59 = vadd.f32 %v299_v51, %v298_v43  ;;  %v517_v2 = vrot.slane %v476_v40, %v3579_v25  ;;  %2079 = vperm.xlu1 %3220, %v2017_v26  }
  0x3e   :  { %v3768_v63 = vpop.eup %3257  ;;  %3283 = vpow2.f32 %v287_v34  ;;  %v301_v1 = vsel %vm58_vm0, %v3761_v57, 0.0  ;;  %v521_v3 = vrot.slane %v484_v44, %v3579_v25  ;;  %v525_v7 = vrot.slane %v486_v49, %v3579_v25 }
  0x3f   :  { %v3774_v4 = vpop.eup %3259  ;;  %v291_v5 = vadd.f32 %v3768_v63, %v290_v58  ;;  %v302_v6 = vadd.f32 %v301_v1, %v300_v59  ;;  %v529_v12 = vrot.slane %v469_v39, %v3579_v25  ;;  %v533_v14 = vrot.slane %v483_v41, %v3579_v25 }
  0x40   :  { %v3779_v61 = vpop.eup %3261  ;;  %v303_v13 = vsel %vm58_vm0, %v3774_v4, 0.0  ;;  %v3785_v16 = vrot.slane %v485_v48, %v3579_v25  ;;  %v583_v17 = vsel %vm581_vm4, %v3612_v52, %v3614_v53  ;;  %v3798_v23 = vrot.slane %v487_v54, %v3579_v25 }
  0x41   :  { %2064 = vperm.xlu0 %3219, %v2014_v56   ;;  %v3794_v19 = vpop.eup %3263  ;;  %v292_v21 = vadd.f32 %v3779_v61, %v291_v5  ;;  %v304_v22 = vadd.f32 %v303_v13, %v302_v6  ;;  %v560_v24 = vmul.f32 %v513_v60, %v3548_v9  ;;  %v561_v27 = vmul.f32 %v513_v60, %v3553_v10  ;;  %v2008_v6 = vld [vmem:[%s5068_s7 + $0x10] sm:$0xff] }
  0x42   :  { %v3804_v52 = vpop.eup %3265  ;;  %v305_v53 = vsel %vm58_vm0, %v3794_v19, 0.0  ;;  %v3811_v28 = vmul.f32 %v3726_v31, %v3649_v15  ;;  %v3814_v29 = vmul.f32 %v583_v17, %v3692_v0  ;;  %v3820_v33 = vrot.slane %v502_v45, %v3579_v25  ;;  %v2015_v45 = vld [vmem:[%s5068_s7 + $0x48] sm:$0xff] }
  0x43   :  { %v3816_v8 = vpop.eup %3267  ;;  %v293_v11 = vadd.f32 %v3804_v52, %v292_v21  ;;  %v306_v30 = vadd.f32 %v305_v53, %v304_v22  ;;  %v3823_v34 = vrot.slane %v509_v55, %v3579_v25  ;;  %v562_v0 = vmul.f32 %v517_v2, %v3548_v9  ;;  %2069 = vperm.xlu1 %3220, %v2015_v45  }
  0x44   :  { %v3825_v35 = vpop.eup %3269  ;;  %v307_v15 = vsel %vm58_vm0, %v3816_v8, 0.0  ;;  %v563_v31 = vmul.f32 %v517_v2, %v3553_v10  ;;  %v564_v36 = vmul.f32 %v521_v3, %v3548_v9  ;;  %v565_v43 = vmul.f32 %v521_v3, %v3553_v10 }
  0x45   :  { %2054 = vperm.xlu0 %3219, %v2012_v18   ;;  %v3835_v39 = vpop.eup %3271  ;;  %v294_v40 = vadd.f32 %v3825_v35, %v293_v11  ;;  %v308_v41 = vadd.f32 %v307_v15, %v306_v30  ;;  %v566_v44 = vmul.f32 %v525_v7, %v3548_v9  ;;  %v567_v49 = vmul.f32 %v525_v7, %v3553_v10 }
  0x46   :  { %v3843_v47 = vpop.eup %3273  ;;  %v309_v48 = vsel %vm58_vm0, %v3835_v39, 0.0  ;;  %v586_v51 = vsub.f32 %v560_v24, %v3811_v28  ;;  %v587_v54 = vsub.f32 %v561_v27, %v3814_v29  ;;  %v568_v59 = vmul.f32 %v529_v12, %v3548_v9 }
  0x47   :  { %v3850_v55 = vpop.eup %3275  ;;  %v295_v56 = vadd.f32 %v3843_v47, %v294_v40  ;;  %v310_v58 = vadd.f32 %v309_v48, %v308_v41  ;;  %v3855_v60 = vmul.f32 %v529_v12, %v3553_v10  ;;  %v3862_v2 = vmul.f32 %v533_v14, %v3548_v9  ;;  %v2006_v40 = vld [vmem:[%s5068_s7] sm:$0xff] }
  0x48   :  { %v3857_v62 = vpop.eup %3277  ;;  %v311_v1 = vsel %vm58_vm0, %v3850_v55, 0.0  ;;  %v3865_v3 = vmul.f32 %v533_v14, %v3553_v10  ;;  %v588_v5 = vsub.f32 %v562_v0, %v3811_v28  ;;  %v3876_v17 = vmul.f32 %v3785_v16, %v3548_v9  ;;  %v2013_v14 = vld [vmem:[%s5068_s7 + $0x38] sm:$0xff] }
  0x49   :  { %2044 = vperm.xlu0 %3219, %v2010_v37   ;;  %v3871_v7 = vpop.eup %3279  ;;  %v296_v12 = vadd.f32 %v3857_v62, %v295_v56  ;;  %v312_v13 = vadd.f32 %v311_v1, %v310_v58  ;;  %v589_v18 = vsub.f32 %v563_v31, %v3814_v29  ;;  %v590_v24 = vsub.f32 %v564_v36, %v3811_v28 }
  0x4a   :  { %v3882_v21 = vpop.eup %3281  ;;  %v313_v22 = vsel %vm58_vm0, %v3871_v7, 0.0  ;;  %v606_v26 = vmul.f32 1.442695, %v586_v51  ;;  %v608_v53 = vmul.f32 1.442695, %v587_v54  ;;  %v573_v15 = vmul.f32 %v3785_v16, %v3553_v10  ;;  %2059 = vperm.xlu1 %3220, %v2013_v14  }
  0x4b   :  { %v3887_v27 = vpop.eup %3283  ;;  %v297_v11 = vadd.f32 %v3882_v21, %v296_v12  ;;  %v314_v30 = vadd.f32 %v313_v22, %v312_v13  ;;  %v591_v0 = vsub.f32 %v565_v43, %v3814_v29  ;;  %v592_v37 = vsub.f32 %v566_v44, %v3811_v28  ;;  %v2011_v43 = vld [vmem:[%s5068_s7 + $0x28] sm:$0xff]  ;;  %v2382_v13 = vld [vmem:[%s5070_s9 + $0xf0] sm:$0xff] }
  0x4c   :  { %v315_v31 = vsel %vm58_vm0, %v3887_v27, 0.0  ;;  %3285 = vpow2.f32 %v606_v26  ;;  %v610_v36 = vmul.f32 1.442695, %v588_v5  ;;  %v593_v45 = vsub.f32 %v567_v49, %v3814_v29  ;;  %v2366_v26 = vld [vmem:[%s5070_s9 + $0x70] sm:$0xff] }
  0x4d   :  { %2034 = vperm.xlu0 %3219, %v2008_v6   ;;  %v316_v41 = vadd.f32 %v315_v31, %v314_v30  ;;  %3287 = vrcp.f32 %v297_v11  ;;  %v612_v16 = vmul.f32 1.442695, %v589_v18  ;;  %v574_v48 = vmul.f32 %v3798_v23, %v3548_v9  ;;  %v2009_v18 = vld [vmem:[%s5068_s7 + $0x18] sm:$0xff]  ;;  %v2007_v11 = vld [vmem:[%s5068_s7 + $0x8] sm:$0xff] }
  0x4e   :  { %v594_v44 = vsub.f32 %v568_v59, %v3811_v28  ;;  %3289 = vpow2.f32 %v608_v53  ;;  %v614_v51 = vmul.f32 1.442695, %v590_v24  ;;  %v575_v54 = vmul.f32 %v3798_v23, %v3553_v10  ;;  %v799_v59 = vld [vmem:[%s5063_s2] sm:$0xff]  ;;  %2049 = vperm.xlu1 %3220, %v2011_v43  }
  0x4f   :  { %3291 = vrcp.f32 %v316_v41  ;;  %v595_v56 = vsub.f32 %v3855_v60, %v3814_v29  ;;  %v616_v49 = vmul.f32 1.442695, %v591_v0  ;;  %v576_v58 = vmul.f32 %v3820_v33, %v3548_v9  ;;  %3089 = vmatprep.mubr.msk.f32.mxu0 %vm937_vm5, %v799_v59  ;;  %v2380_v41 = vld [vmem:[%s5070_s9 + $0xe0] sm:$0xff] }
  0x50   :  { %v596_v1 = vsub.f32 %v3862_v2, %v3811_v28  ;;  %3293 = vpow2.f32 %v610_v36  ;;  %v618_v5 = vmul.f32 1.442695, %v592_v37  ;;  %v577_v23 = vmul.f32 %v3820_v33, %v3553_v10 }
  0x51   :  { %2024 = vperm.xlu0 %3219, %v2006_v40   ;;  %v597_v60 = vsub.f32 %v3865_v3, %v3814_v29  ;;  %3295 = vpow2.f32 %v612_v16  ;;  %v620_v6 = vmul.f32 1.442695, %v593_v45  ;;  %v598_v12 = vsub.f32 %v3876_v17, %v3811_v28  ;;  %v2383_v16 = vld [vmem:[%s5070_s9 + $0xf8] sm:$0xff] }
  0x52   :  { %3297 = vpow2.f32 %v614_v51  ;;  %v622_v2 = vmul.f32 1.442695, %v594_v44  ;;  %v578_v33 = vmul.f32 %v3823_v34, %v3548_v9  ;;  %v599_v3 = vsub.f32 %v573_v15, %v3814_v29  ;;  %2039 = vperm.xlu1 %3220, %v2009_v18  }
  0x53   :  { %3299 = vpow2.f32 %v616_v49  ;;  %v624_v14 = vmul.f32 1.442695, %v595_v56  ;;  %v579_v17 = vmul.f32 %v3823_v34, %v3553_v10  ;;  %v600_v22 = vsub.f32 %v574_v48, %v3811_v28 }
  0x54   :  { %3301 = vpow2.f32 %v618_v5  ;;  %v626_v24 = vmul.f32 1.442695, %v596_v1  ;;  %v628_v53 = vmul.f32 1.442695, %v597_v60  ;;  %v601_v30 = vsub.f32 %v575_v54, %v3814_v29  ;;  %v2364_v1 = vld [vmem:[%s5070_s9 + $0x60] sm:$0xff] }
  0x55   :  { %2536 = vperm.xlu0 %3219, %v2382_v13   ;;  %3303 = vpow2.f32 %v620_v6  ;;  %v630_v15 = vmul.f32 1.442695, %v598_v12  ;;  %v602_v34 = vsub.f32 %v576_v58, %v3811_v28  ;;  %v603_v0 = vsub.f32 %v577_v23, %v3814_v29  ;;  %v2367_v6 = vld [vmem:[%s5070_s9 + $0x78] sm:$0xff] }
  0x56   :  { %3305 = vpow2.f32 %v622_v2  ;;  %v632_v31 = vmul.f32 1.442695, %v599_v3  ;;  %v604_v37 = vsub.f32 %v578_v33, %v3811_v28  ;;  %v605_v36 = vsub.f32 %v579_v17, %v3814_v29  ;;  %2029 = vperm.xlu1 %3220, %v2007_v11  }
  0x57   :  { %3307 = vpow2.f32 %v624_v14  ;;  %v634_v40 = vmul.f32 1.442695, %v600_v22  ;;  %v636_v48 = vmul.f32 1.442695, %v601_v30  ;;  %v638_v44 = vmul.f32 1.442695, %v602_v34 }
  0x58   :  { %3309 = vpow2.f32 %v626_v24  ;;  %v640_v51 = vmul.f32 1.442695, %v603_v0  ;;  %v642_v56 = vmul.f32 1.442695, %v604_v37  ;;  %v644_v49 = vmul.f32 1.442695, %v605_v36 }
  0x59   :  { %2456 = vperm.xlu0 %3219, %v2366_v26   ;;  %v3950_v45 = vpop.eup %3285  ;;  %3311 = vpow2.f32 %v628_v53  ;;  %v2381_v22 = vld [vmem:[%s5070_s9 + $0xe8] sm:$0xff] }
  0x5a   :  { %v3288_v43 = vpop.eup %3287  ;;  %3313 = vpow2.f32 %v630_v15  ;;  %2541 = vperm.xlu1 %3220, %v2383_v16   ;;  %v2362_v16 = vld [vmem:[%s5070_s9 + $0x50] sm:$0xff] }
  0x5b   :  { %v3955_v28 = vpop.eup %3289  ;;  %v3958_v29 = vmul.f32 %v3288_v43, %v3548_v9  ;;  %3315 = vpow2.f32 %v632_v31 }
  0x5c   :  { %v3292_v54 = vpop.eup %3291  ;;  %3317 = vpow2.f32 %v634_v40  ;;  %v655_v58 = vsel %vm58_vm0, %v3955_v28, 0.0 }
  0x5d   :  { %2526 = vperm.xlu0 %3219, %v2380_v41   ;;  %v3965_v5 = vpop.eup %3293  ;;  %v3968_v9 = vmul.f32 %v3292_v54, %v3553_v10  ;;  %v321_v59 = vmul.f32 %v3728_v32, %v3958_v29  ;;  %v323_v23 = vmul.f32 %v3743_v42, %v3958_v29  ;;  %v325_v60 = vmul.f32 %v3753_v50, %v3958_v29  ;;  %v2365_v54 = vld [vmem:[%s5070_s9 + $0x68] sm:$0xff] }
  0x5e   :  { %v3979_v12 = vpop.eup %3295  ;;  %v337_v2 = vmul.f32 %v3857_v62, %v3958_v29  ;;  %v339_v10 = vmul.f32 %v3882_v21, %v3958_v29  ;;  %3319 = vpow2.f32 %v636_v48  ;;  %v646_v32 = vadd.f32 %v3965_v5, %v3950_v45  ;;  %2461 = vperm.xlu1 %3220, %v2367_v6  }
  0x5f   :  { %v3987_v42 = vpop.eup %3297  ;;  %v322_v50 = vmul.f32 %v3738_v38, %v3968_v9  ;;  %v324_v13 = vmul.f32 %v3749_v46, %v3968_v9  ;;  %v326_v18 = vmul.f32 %v3761_v57, %v3968_v9  ;;  %v338_v62 = vmul.f32 %v3871_v7, %v3968_v9  ;;  %v2378_v46 = vld [vmem:[%s5070_s9 + $0xd0] sm:$0xff] }
  0x60   :  { %v3997_v21 = vpop.eup %3299  ;;  %v340_v33 = vmul.f32 %v3887_v27, %v3968_v9  ;;  %3321 = vpow2.f32 %v638_v44  ;;  %v647_v3 = vadd.f32 %v3987_v42, %v646_v32  ;;  %v656_v38 = vsel %vm58_vm0, %v3979_v12, 0.0  ;;  %v2376_v32 = vld [vmem:[%s5070_s9 + $0xc0] sm:$0xff] }
  0x61   :  { %2446 = vperm.xlu0 %3219, %v2364_v1   ;;  %v4007_v57 = vpop.eup %3301  ;;  %v341_v7 = vsel %vm58_vm0, %v322_v50, 0.0  ;;  %v349_v14 = vsel %vm58_vm0, %v324_v13, 0.0  ;;  %v357_v17 = vsel %vm58_vm0, %v326_v18, 0.0  ;;  %v405_v27 = vsel %vm58_vm0, %v338_v62, 0.0  ;;  %v2379_v62 = vld [vmem:[%s5070_s9 + $0xd8] sm:$0xff] }
  0x62   :  { %v4016_v24 = vpop.eup %3303  ;;  %v342_v26 = vadd.f32 %v341_v7, %v321_v59  ;;  %v350_v53 = vadd.f32 %v349_v14, %v323_v23  ;;  %v358_v11 = vadd.f32 %v357_v17, %v325_v60  ;;  %v406_v30 = vadd.f32 %v405_v27, %v337_v2  ;;  %2531 = vperm.xlu1 %3220, %v2381_v22  }
  0x63   :  { %v4018_v15 = vpop.eup %3305  ;;  %v413_v34 = vsel %vm58_vm0, %v340_v33, 0.0  ;;  %3323 = vpow2.f32 %v640_v51  ;;  %v648_v0 = vadd.f32 %v4007_v57, %v647_v3  ;;  %v657_v31 = vadd.f32 %v656_v38, %v655_v58 }
  0x64   :  { %v4022_v37 = vpop.eup %3307  ;;  %v343_v36 = vrot.slane %v342_v26, 4  ;;  %v351_v40 = vrot.slane %v350_v53, 4  ;;  %v359_v41 = vrot.slane %v358_v11, 4  ;;  %v414_v48 = vadd.f32 %v413_v34, %v339_v10  ;;  %v2363_v34 = vld [vmem:[%s5070_s9 + $0x58] sm:$0xff] }
  0x65   :  { %2516 = vperm.xlu0 %3219, %v2378_v46   ;;  %v4027_v43 = vpop.eup %3309  ;;  %3325 = vpow2.f32 %v642_v56  ;;  %v649_v44 = vadd.f32 %v4018_v15, %v648_v0  ;;  %v658_v51 = vsel %vm58_vm0, %v3997_v21, 0.0  ;;  %v407_v59 = vrot.slane %v406_v30, 4 }
  0x66   :  { %v4035_v58 = vpop.eup %3311  ;;  %3327 = vpow2.f32 %v644_v49  ;;  %v659_v60 = vadd.f32 %v658_v51, %v657_v31  ;;  %v344_v6 = vadd.f32 %v343_v36, %v342_v26  ;;  %v352_v2 = vadd.f32 %v351_v40, %v350_v53  ;;  %2451 = vperm.xlu1 %3220, %v2365_v54   ;;  %v2360_v26 = vld [vmem:[%s5070_s9 + $0x40] sm:$0xff]  ;;  %v2374_v54 = vld [vmem:[%s5070_s9 + $0xb0] sm:$0xff] }
  0x67   :  { %v4037_v1 = vpop.eup %3313  ;;  %v650_v23 = vadd.f32 %v4027_v43, %v649_v44  ;;  %v360_v10 = vadd.f32 %v359_v41, %v358_v11  ;;  %v415_v13 = vrot.slane %v414_v48, 4  ;;  %v660_v49 = vsel %vm58_vm0, %v4016_v24, 0.0 }
  0x68   :  { %v4040_v56 = vpop.eup %3315  ;;  %v662_v33 = vsel %vm58_vm0, %v4022_v37, 0.0  ;;  %v4057_v38 = vadd.f32 %v407_v59, %v406_v30  ;;  %v661_v7 = vadd.f32 %v660_v49, %v659_v60  ;;  %v345_v14 = vrot.slane %v344_v6, 2 }
  0x69   :  { %2436 = vperm.xlu0 %3219, %v2362_v16   ;;  %v4045_v50 = vpop.eup %3317  ;;  %v651_v18 = vadd.f32 %v4037_v1, %v650_v23  ;;  %v353_v17 = vrot.slane %v352_v2, 2  ;;  %v361_v27 = vrot.slane %v360_v10, 2  ;;  %v664_v22 = vsel %vm58_vm0, %v4035_v58, 0.0 }
  0x6a   :  { %2521 = vperm.xlu1 %3220, %v2379_v62   ;;  %v416_v11 = vadd.f32 %v415_v13, %v414_v48  ;;  %v663_v30 = vadd.f32 %v662_v33, %v661_v7  ;;  %v666_v0 = vsel %vm58_vm0, %v4040_v56, 0.0  ;;  %v409_v31 = vrot.slane %v4057_v38, 2 }
  0x6b   :  { %v4055_v3 = vpop.eup %3319  ;;  %v652_v46 = vadd.f32 %v4045_v50, %v651_v18  ;;  %v4076_v16 = vadd.f32 %v345_v14, %v344_v6  ;;  %v4078_v44 = vadd.f32 %v353_v17, %v352_v2  ;;  %v4080_v48 = vadd.f32 %v361_v27, %v360_v10  ;;  %v2377_v2 = vld [vmem:[%s5070_s9 + $0xc8] sm:$0xff] }
  0x6c   :  { %v665_v40 = vadd.f32 %v664_v22, %v663_v30  ;;  %v668_v51 = vsel %vm58_vm0, %v4055_v3, 0.0  ;;  %v417_v59 = vrot.slane %v416_v11, 2  ;;  %v327_v60 = vmul.f32 %v3768_v63, %v3958_v29 }
  0x6d   :  { %2506 = vperm.xlu0 %3219, %v2376_v32   ;;  %v4065_v53 = vpop.eup %3321  ;;  %v328_v6 = vmul.f32 %v3774_v4, %v3968_v9  ;;  %v329_v13 = vmul.f32 %v3779_v61, %v3958_v29  ;;  %v330_v18 = vmul.f32 %v3794_v19, %v3968_v9  ;;  %v332_v63 = vmul.f32 %v3816_v8, %v3968_v9 }
  0x6e   :  { %v653_v36 = vadd.f32 %v4065_v53, %v652_v46  ;;  %2441 = vperm.xlu1 %3220, %v2363_v34   ;;  %v667_v23 = vadd.f32 %v666_v0, %v665_v40  ;;  %v331_v62 = vmul.f32 %v3804_v52, %v3958_v29  ;;  %v333_v33 = vmul.f32 %v3825_v35, %v3958_v29  ;;  %v2358_v52 = vld [vmem:[%s5070_s9 + $0x30] sm:$0xff] }
  0x6f   :  { %v334_v61 = vmul.f32 %v3835_v39, %v3968_v9  ;;  %v335_v19 = vmul.f32 %v3843_v47, %v3958_v29  ;;  %v336_v8 = vmul.f32 %v3850_v55, %v3968_v9  ;;  %v365_v7 = vsel %vm58_vm0, %v328_v6, 0.0  ;;  %v2361_v39 = vld [vmem:[%s5070_s9 + $0x48] sm:$0xff]  ;;  %v2375_v6 = vld [vmem:[%s5070_s9 + $0xb8] sm:$0xff] }
  0x70   :  { %v4074_v41 = vpop.eup %3323  ;;  %v669_v49 = vadd.f32 %v668_v51, %v667_v23  ;;  %v366_v17 = vadd.f32 %v365_v7, %v327_v60  ;;  %v373_v47 = vsel %vm58_vm0, %v330_v18, 0.0  ;;  %v381_v55 = vsel %vm58_vm0, %v332_v63, 0.0  ;;  %v2372_v51 = vld [vmem:[%s5070_s9 + $0xa0] sm:$0xff] }
  0x71   :  { %2426 = vperm.xlu0 %3219, %v2360_v26   ;;  %v670_v32 = vsel %vm58_vm0, %v4074_v41, 0.0  ;;  %v389_v29 = vsel %vm58_vm0, %v334_v61, 0.0  ;;  %v397_v9 = vsel %vm58_vm0, %v336_v8, 0.0  ;;  %v374_v26 = vadd.f32 %v373_v47, %v329_v13  ;;  %v2356_v18 = vld [vmem:[%s5070_s9 + $0x20] sm:$0xff] }
  0x72   :  { %v4094_v10 = vpop.eup %3325  ;;  %2511 = vperm.xlu1 %3220, %v2377_v2   ;;  %v671_v35 = vadd.f32 %v670_v32, %v669_v49  ;;  %v367_v22 = vrot.slane %v366_v17, 4  ;;  %v382_v30 = vadd.f32 %v381_v55, %v331_v62  ;;  %v410_v34 = vadd.f32 %v409_v31, %v4057_v38 }
  0x73   :  { %v654_v4 = vadd.f32 %v4094_v10, %v653_v36  ;;  %v4109_v46 = vpop.eup %3327  ;;  %v418_v0 = vadd.f32 %v417_v59, %v416_v11  ;;  %v390_v36 = vadd.f32 %v389_v29, %v333_v33  ;;  %v398_v40 = vadd.f32 %v397_v9, %v335_v19  ;;  %v2359_v33 = vld [vmem:[%s5070_s9 + $0x38] sm:$0xff] }
  0x74   :  { %v672_v14 = vsel %vm58_vm0, %v4109_v46, 0.0  ;;  %v375_v23 = vrot.slane %v374_v26, 4  ;;  %v383_v60 = vrot.slane %v382_v30, 4  ;;  %v347_v11 = vrot.slane %v4076_v16, 1 }
  0x75   :  { %2496 = vperm.xlu0 %3219, %v2374_v54   ;;  %3329 = vrcp.f32 %v654_v4  ;;  %v673_v27 = vadd.f32 %v672_v14, %v671_v35  ;;  %v368_v54 = vadd.f32 %v367_v22, %v366_v17  ;;  %v391_v2 = vrot.slane %v390_v36, 4  ;;  %v2370_v17 = vld [vmem:[%s5070_s9 + $0x90] sm:$0xff]  ;;  %v3421_v22 = vld [vmem:[%s5062_s1] sm:$0xff] }
  0x76   :  { %2431 = vperm.xlu1 %3220, %v2361_v39   ;;  %v399_v32 = vrot.slane %v398_v40, 4  ;;  %v376_v38 = vadd.f32 %v375_v23, %v374_v26  ;;  %v355_v31 = vrot.slane %v4078_v44, 1  ;;  %v363_v59 = vrot.slane %v4080_v48, 1 }
  0x77   :  { %3331 = vrcp.f32 %v673_v27  ;;  %v369_v13 = vrot.slane %v368_v54, 2  ;;  %v411_v63 = vrot.slane %v410_v34, 1  ;;  %v419_v4 = vrot.slane %v418_v0, 1 }
  0x78   :  { %v384_v49 = vadd.f32 %v383_v60, %v382_v30  ;;  %v392_v62 = vadd.f32 %v391_v2, %v390_v36  ;;  %v377_v19 = vrot.slane %v376_v38, 2  ;;  %v400_v8 = vadd.f32 %v399_v32, %v398_v40  ;;  %v2354_v40 = vld [vmem:[%s5070_s9 + $0x10] sm:$0xff] }
  0x79   :  { %2416 = vperm.xlu0 %3219, %v2358_v52   ;;  %v370_v61 = vadd.f32 %v369_v13, %v368_v54  ;;  %v348_v7 = vadd.f32 %v347_v11, %v4076_v16  ;;  %v356_v52 = vadd.f32 %v355_v31, %v4078_v44  ;;  %v364_v35 = vadd.f32 %v363_v59, %v4080_v48  ;;  %v2373_v16 = vld [vmem:[%s5070_s9 + $0xa8] sm:$0xff] }
  0x7a   :  { %2501 = vperm.xlu1 %3220, %v2375_v6   ;;  %v4154_v14 = vstv %s4130_s14  ;;  %v412_v39 = vadd.f32 %v411_v63, %v410_v34  ;;  %v420_v47 = vadd.f32 %v419_v4, %v418_v0  ;;  %v385_v55 = vrot.slane %v384_v49, 2  ;;  %v2357_v6 = vld [vmem:[%s5070_s9 + $0x28] sm:$0xff]  ;;  %s2960_s14 = sld [smem:[#allocation2 + $0x7]] }
  0x7b   :  { %v393_v29 = vrot.slane %v392_v62, 2  ;;  %v371_v44 = vrot.slane %v370_v61, 1  ;;  %v4162_v27 = vadd.f32 %v377_v19, %v376_v38  ;;  %v401_v48 = vrot.slane %v400_v8, 2  ;;  %v3422_v31 = vld [vmem:[%s5062_s1 + $0x8] sm:$0x3]  ;;  %s2958_s1 = sld [smem:[#allocation2 + $0x6]] }
  0x7c   :  { %v4170_v30 = vmul.f32 %v4154_v14, %v348_v7  ;;  %v4173_v34 = vmul.f32 %v4154_v14, %v356_v52  ;;  %v4176_v0 = vmul.f32 %v4154_v14, %v364_v35  ;;  %v4179_v36 = vstv %s4142_s19 }
  0x7d   :  { %2486 = vperm.xlu0 %3219, %v2372_v51   ;;  %v4185_v51 = vmul.f32 %v4154_v14, %v412_v39  ;;  %v4188_v54 = vmul.f32 %v4154_v14, %v420_v47  ;;  %v4190_v23 = vadd.f32 %v385_v55, %v384_v49  ;;  %v4192_v60 = vadd.f32 %v393_v29, %v392_v62  ;;  %v2355_v47 = vld [vmem:[%s5070_s9 + $0x18] sm:$0xff] }
  0x7e   :  { %2421 = vperm.xlu1 %3220, %v2359_v33   ;;  %v4199_v13 = vadd.f32 %v371_v44, %v370_v61  ;;  %v379_v38 = vrot.slane %v4162_v27, 1  ;;  %v4202_v11 = vadd.f32 %v401_v48, %v400_v8 }
  0x81   :  { %2406 = vperm.xlu0 %3219, %v2356_v18  }
  0x82   :  { %v3330_v9 = vpop.eup %3329  ;;  %2491 = vperm.xlu1 %3220, %v2373_v16  }
  0x83   :  { %v4167_v26 = vmul.f32 %v3421_v22, %v3330_v9 }
  0x84   :  { %v3332_v2 = vpop.eup %3331 }
  0x85   :  { %2476 = vperm.xlu0 %3219, %v2370_v17   ;;  %v678_v32 = vmul.f32 %v3950_v45, %v4167_v26  ;;  %v4207_v59 = vmul.f32 %v3422_v31, %v3332_v2  ;;  %v680_v18 = vmul.f32 %v3965_v5, %v4167_v26  ;;  %v682_v63 = vmul.f32 %v3987_v42, %v4167_v26  ;;  %v2368_v5 = vld [vmem:[%s5070_s9 + $0x80] sm:$0xff] }
  0x86   :  { %v694_v45 = vmul.f32 %v4065_v53, %v4167_v26  ;;  %v696_v4 = vmul.f32 %v4094_v10, %v4167_v26  ;;  %v684_v49 = vmul.f32 %v4007_v57, %v4167_v26  ;;  %v686_v62 = vmul.f32 %v4018_v15, %v4167_v26  ;;  %2411 = vperm.xlu1 %3220, %v2357_v6  }
  0x87   :  { %v688_v33 = vmul.f32 %v4027_v43, %v4167_v26  ;;  %v679_v42 = vmul.f32 %v3955_v28, %v4207_v59  ;;  %v681_v53 = vmul.f32 %v3979_v12, %v4207_v59  ;;  %v683_v57 = vmul.f32 %v3997_v21, %v4207_v59  ;;  %v2371_v43 = vld [vmem:[%s5070_s9 + $0x98] sm:$0xff] }
  0x88   :  { %v695_v15 = vmul.f32 %v4074_v41, %v4207_v59  ;;  %v697_v10 = vmul.f32 %v4109_v46, %v4207_v59  ;;  %v685_v61 = vmul.f32 %v4016_v24, %v4207_v59  ;;  %v687_v28 = vmul.f32 %v4022_v37, %v4207_v59  ;;  %v2352_v24 = vld [vmem:[%s5070_s9] sm:$0xff] }
  0x89   :  { %2396 = vperm.xlu0 %3219, %v2354_v40   ;;  %v689_v12 = vmul.f32 %v4035_v58, %v4207_v59  ;;  %v698_v21 = vsel %vm58_vm0, %v679_v42, 0.0  ;;  %v706_v41 = vsel %vm58_vm0, %v681_v53, 0.0  ;;  %v714_v19 = vsel %vm58_vm0, %v683_v57, 0.0 }
  0x8a   :  { %v762_v8 = vsel %vm58_vm0, %v695_v15, 0.0  ;;  %v699_v7 = vadd.f32 %v698_v21, %v678_v32  ;;  %v707_v46 = vadd.f32 %v706_v41, %v680_v18  ;;  %v715_v52 = vadd.f32 %v714_v19, %v682_v63  ;;  %2481 = vperm.xlu1 %3220, %v2371_v43   ;;  %v2850_v32 = vld [vmem:[%s5072_s11] sm:$0x3] }
  0x8b   :  { %v763_v35 = vadd.f32 %v762_v8, %v694_v45  ;;  %v770_v37 = vsel %vm58_vm0, %v697_v10, 0.0  ;;  %v4255_v58 = vmul.f32 %v4037_v1, %v4167_v26  ;;  %v4259_v17 = vmul.f32 %v4040_v56, %v4207_v59  ;;  %v2353_v8 = vld [vmem:[%s5070_s9 + $0x8] sm:$0xff] }
  0x8c   :  { %v722_v39 = vsel %vm58_vm0, %v685_v61, 0.0  ;;  %v700_v55 = vrot.slane %v699_v7, 4  ;;  %v708_v29 = vrot.slane %v707_v46, 4  ;;  %v716_v16 = vrot.slane %v715_v52, 4 }
  0x8d   :  { %2466 = vperm.xlu0 %3219, %v2368_v5   ;;  %v764_v9 = vrot.slane %v763_v35, 4  ;;  %v771_v44 = vadd.f32 %v770_v37, %v696_v4  ;;  %v723_v48 = vadd.f32 %v722_v39, %v684_v49  ;;  %v730_v22 = vsel %vm58_vm0, %v687_v28, 0.0  ;;  %v2369_v4 = vld [vmem:[%s5070_s9 + $0x88] sm:$0xff] }
  0x8e   :  { %v738_v1 = vsel %vm58_vm0, %v689_v12, 0.0  ;;  %v701_v40 = vadd.f32 %v700_v55, %v699_v7  ;;  %v709_v56 = vadd.f32 %v708_v29, %v707_v46  ;;  %v717_v6 = vadd.f32 %v716_v16, %v715_v52  ;;  %2401 = vperm.xlu1 %3220, %v2355_v47  }
  0x8f   :  { %v765_v2 = vadd.f32 %v764_v9, %v763_v35  ;;  %v772_v31 = vrot.slane %v771_v44, 4  ;;  %v724_v18 = vrot.slane %v723_v48, 4  ;;  %v731_v63 = vadd.f32 %v730_v22, %v686_v62 }
  0x90   :  { %v739_v45 = vadd.f32 %v738_v1, %v688_v33  ;;  %v702_v49 = vrot.slane %v701_v40, 2  ;;  %v710_v5 = vrot.slane %v709_v56, 2  ;;  %v718_v42 = vrot.slane %v717_v6, 2 }
  0x91   :  { %2386 = vperm.xlu0 %3219, %v2352_v24   ;;  %v766_v53 = vrot.slane %v765_v2, 2  ;;  %v773_v57 = vadd.f32 %v772_v31, %v771_v44  ;;  %v725_v15 = vadd.f32 %v724_v18, %v723_v48  ;;  %v732_v43 = vrot.slane %v731_v63, 4 }
  0x92   :  { %v740_v10 = vrot.slane %v739_v45, 4  ;;  %v703_v61 = vadd.f32 %v702_v49, %v701_v40  ;;  %v711_v28 = vadd.f32 %v710_v5, %v709_v56  ;;  %v719_v12 = vadd.f32 %v718_v42, %v717_v6  ;;  %2471 = vperm.xlu1 %3220, %v2369_v4  }
  0x93   :  { %v767_v21 = vadd.f32 %v766_v53, %v765_v2  ;;  %v774_v62 = vrot.slane %v773_v57, 2  ;;  %v726_v33 = vrot.slane %v725_v15, 2  ;;  %v733_v41 = vadd.f32 %v732_v43, %v731_v63 }
  0x94   :  { %v741_v19 = vadd.f32 %v740_v10, %v739_v45  ;;  %v704_v7 = vrot.slane %v703_v61, 1  ;;  %v712_v46 = vrot.slane %v711_v28, 1  ;;  %v720_v52 = vrot.slane %v719_v12, 1 }
  0x95   :  { %2853 = vperm.xlu0 %3219, %v2850_v32   ;;  %v768_v35 = vrot.slane %v767_v21, 1  ;;  %v775_v24 = vadd.f32 %v774_v62, %v773_v57  ;;  %v727_v37 = vadd.f32 %v726_v33, %v725_v15  ;;  %v734_v39 = vrot.slane %v733_v41, 2 }
  0x96   :  { %v742_v47 = vrot.slane %v741_v19, 2  ;;  %v705_v55 = vadd.f32 %v704_v7, %v703_v61  ;;  %v713_v29 = vadd.f32 %v712_v46, %v711_v28  ;;  %v721_v16 = vadd.f32 %v720_v52, %v719_v12  ;;  %2391 = vperm.xlu1 %3220, %v2353_v8  }
  0x97   :  { %v769_v9 = vadd.f32 %v768_v35, %v767_v21  ;;  %v776_v44 = vrot.slane %v775_v24, 1  ;;  %v728_v48 = vrot.slane %v727_v37, 1  ;;  %v735_v22 = vadd.f32 %v734_v39, %v733_v41 }
  0x98   :  { %v743_v1 = vadd.f32 %v742_v47, %v741_v19  ;;  %v779_v40 = vmul.f32 %v4179_v36, %v705_v55  ;;  %v780_v56 = vmul.f32 %v4179_v36, %v713_v29  ;;  %v693_v2 = vmul.f32 %v4055_v3, %v4207_v59 }
  0x99   :  { %v787_v6 = vmul.f32 %v4179_v36, %v769_v9  ;;  %v777_v32 = vadd.f32 %v776_v44, %v775_v24  ;;  %v692_v31 = vmul.f32 %v4045_v50, %v4167_v26  ;;  %v729_v18 = vadd.f32 %v728_v48, %v727_v37 }
  0x9a   :  { %v736_v63 = vrot.slane %v735_v22, 1  ;;  %v781_v45 = vmul.f32 %v4179_v36, %v721_v16  ;;  %v789_v4 = vadd.f32 %v779_v40, %v4170_v30  ;;  %v387_v49 = vrot.slane %v4190_v23, 1 }
  0x9b   :  { %v744_v5 = vrot.slane %v743_v1, 1  ;;  %v788_v42 = vmul.f32 %v4179_v36, %v777_v32  ;;  %v790_v53 = vadd.f32 %v780_v56, %v4173_v34  ;;  %v797_v57 = vadd.f32 %v787_v6, %v4185_v51  ;;  %v800_v32 = vld [vmem:[%s5063_s2 + $0x8] sm:$0xff] }
  0x9c   :  { %v746_v3 = vsel %vm58_vm0, %v4259_v17, 0.0  ;;  %v380_v50 = vadd.f32 %v379_v38, %v4162_v27  ;;  %v737_v26 = vadd.f32 %v736_v63, %v735_v22  ;;  %v754_v30 = vsel %vm58_vm0, %v693_v2, 0.0  ;;  %v805_v63 = vld [vmem:[%s5063_s2 + $0x30] sm:$0xff] }
  0x9d   :  { %v747_v59 = vadd.f32 %v746_v3, %v4255_v58  ;;  %v798_v15 = vadd.f32 %v788_v42, %v4188_v54  ;;  %v425_v43 = vmul.f32 %v4154_v14, %v4199_v13  ;;  %v755_v34 = vadd.f32 %v754_v30, %v692_v31  ;;  %v803_v31 = vld [vmem:[%s5063_s2 + $0x20] sm:$0xff]  ;;  %v810_v42 = vld [vmem:[%s5063_s2 + $0x58] sm:$0xff]  ;;  %v813_v3 = vld [vmem:[%s5063_s2 + $0x70] sm:$0xff] }
  0x9e   :  { %v782_v51 = vmul.f32 %v4179_v36, %v729_v18  ;;  %v791_v10 = vadd.f32 %v781_v45, %v4176_v0  ;;  %v388_v17 = vadd.f32 %v387_v49, %v4190_v23  ;;  %v922_v27 = vsel %vm921_vm6, %v790_v53, %v789_v4  ;;  %v804_v18 = vld [vmem:[%s5063_s2 + $0x28] sm:$0xff]  ;;  %v806_v45 = vld [vmem:[%s5063_s2 + $0x38] sm:$0xff]  ;;  %v807_v4 = vld [vmem:[%s5063_s2 + $0x40] sm:$0xff] }
  0x9f   :  { %v748_v61 = vrot.slane %v747_v59, 4  ;;  %v935_v38 = vsel %vm921_vm6, %v798_v15, %v797_v57  ;;  %v745_v58 = vadd.f32 %v744_v5, %v743_v1  ;;  %v756_v28 = vrot.slane %v755_v34, 4  ;;  %v808_v49 = vld [vmem:[%s5063_s2 + $0x48] sm:$0xff]  ;;  %v809_v5 = vld [vmem:[%s5063_s2 + $0x50] sm:$0xff]  ;;  %v811_v53 = vld [vmem:[%s5063_s2 + $0x60] sm:$0xff] }
  0xa0   :  { %3085 = vmatprep.subr.msk.mxu0 %vm58_vm0, %v935_v38  ;;  %v395_v54 = vrot.slane %v4192_v60, 1  ;;  %v426_v13 = vmul.f32 %v4154_v14, %v380_v50  ;;  %v783_v21 = vmul.f32 %v4179_v36, %v737_v26  ;;  %v403_v0 = vrot.slane %v4202_v11, 1  ;;  %v812_v57 = vld [vmem:[%s5063_s2 + $0x68] sm:$0xff]  ;;  %v814_v50 = vld [vmem:[%s5063_s2 + $0x78] sm:$0xff]  ;;  %v1149_v26 = vld [vmem:[%s5065_s4] sm:$0xff] }
  0xa1   :  { %v749_v12 = vadd.f32 %v748_v61, %v747_v59  ;;  %3086 = vmatpush3.msk.msra.mxu0 %vm58_vm0, %v935_v38  ;;  %v757_v23 = vadd.f32 %v756_v28, %v755_v34  ;;  %v792_v62 = vadd.f32 %v782_v51, %v425_v43  ;;  %v924_v33 = vsel %vm923_vm7, %v791_v10, %v922_v27  ;;  %v909_v10 = vpop.permute.xlu0 %908  ;;  %v899_v61 = vpop.permute.xlu1 %898 }
  0xa2   :  { %v427_v19 = vmul.f32 %v4154_v14, %v388_v17  ;;  %v784_v7 = vmul.f32 %v4179_v36, %v745_v58  ;;  %v396_v46 = vadd.f32 %v395_v54, %v4192_v60  ;;  %v793_v35 = vadd.f32 %v783_v21, %v426_v13 }
  0xa3   :  { %v750_v41 = vrot.slane %v749_v12, 2  ;;  %v758_v8 = vrot.slane %v757_v23, 2  ;;  %v404_v24 = vadd.f32 %v403_v0, %v4202_v11  ;;  %v926_v39 = vsel %vm925_vm8, %v792_v62, %v924_v33 }
  0xa4   :  { %v794_v29 = vadd.f32 %v784_v7, %v427_v19  ;;  %v428_v16 = vmul.f32 %v4154_v14, %v396_v46  ;;  %v928_v44 = vsel %vm927_vm9, %v793_v35, %v926_v39 }
  0xa5   :  { %v751_v52 = vadd.f32 %v750_v41, %v749_v12  ;;  %v759_v37 = vadd.f32 %v758_v8, %v757_v23  ;;  %v429_v48 = vmul.f32 %v4154_v14, %v404_v24  ;;  %v801_v14 = vld [vmem:[%s5063_s2 + $0x10] sm:$0xff]  ;;  %v904_v58 = vpop.permute.xlu0 %903  ;;  %v894_v54 = vpop.permute.xlu1 %893 }
  0xa6   :  { %v930_v1 = vsel %vm929_vm10, %v794_v29, %v928_v44 }
  0xa7   :  { %v752_v47 = vrot.slane %v751_v52, 1  ;;  %v760_v55 = vrot.slane %v759_v37, 1 }
  0xa9   :  { %v753_v9 = vadd.f32 %v752_v47, %v751_v52  ;;  %v761_v60 = vadd.f32 %v760_v55, %v759_v37  ;;  %v889_v21 = vpop.permute.xlu0 %888  ;;  %v884_v23 = vpop.permute.xlu1 %883 }
  0xab   :  { %v785_v22 = vmul.f32 %v4179_v36, %v753_v9  ;;  %v786_v11 = vmul.f32 %v4179_v36, %v761_v60  ;;  %v802_v36 = vld [vmem:[%s5063_s2 + $0x18] sm:$0xff] }
  0xad   :  { %v795_v40 = vadd.f32 %v785_v22, %v428_v16  ;;  %v796_v56 = vadd.f32 %v786_v11, %v429_v48  ;;  %v879_v19 = vpop.permute.xlu0 %878  ;;  %v874_v35 = vpop.permute.xlu1 %873 }
  0xaf   :  { %v932_v6 = vsel %vm931_vm11, %v795_v40, %v930_v1 }
  0xb0   :  { %v934_v2 = vsel %vm933_vm12, %v796_v56, %v932_v6 }
  0xb1   :  { %3087 = vmatprep.subr.mxu0 %v934_v2  ;;  %v869_v55 = vpop.permute.xlu0 %868  ;;  %v864_v9 = vpop.permute.xlu1 %863 }
  0xb2   :  { %3088 = vmatpush3.msra.mxu0 %v934_v2 }
  0xb3   :  { %3090 = vmatmul.mubr.msk.f32.vlgmr.msra.gmra.mxu0 %vm937_vm5, %v800_v32 }
  0xb4   :  { %3092 = vmatprep.mubr.msk.f32.mxu0 %vm937_vm5, %v801_v14 }
  0xb5   :  { %v859_v11 = vpop.permute.xlu0 %858  ;;  %v854_v56 = vpop.permute.xlu1 %853 }
  0xb7   :  { %3093 = vmatmul.mubr.msk.f32.gmra.mxu0 %vm937_vm5, %v802_v36 }
  0xb8   :  { %3095 = vmatprep.mubr.msk.f32.mxu0 %vm937_vm5, %v803_v31 }
  0xb9   :  { %v849_v36 = vpop.permute.xlu0 %848 }
  0xbb   :  { %3096 = vmatmul.mubr.msk.f32.gmra.mxu0 %vm937_vm5, %v804_v18 }
  0xbc   :  { %3098 = vmatprep.mubr.msk.f32.mxu0 %vm937_vm5, %v805_v63  ;;  %v844_v63 = vpop.permute.xlu1 %843 }
  0xbf   :  { %3099 = vmatmul.mubr.msk.f32.gmra.mxu0 %vm937_vm5, %v806_v45 }
  0xc0   :  { %3101 = vmatprep.mubr.msk.f32.mxu0 %vm937_vm5, %v807_v4 }
  0xc3   :  { %3102 = vmatmul.mubr.msk.f32.gmra.mxu0 %vm937_vm5, %v808_v49 }
  0xc4   :  { %3104 = vmatprep.mubr.msk.f32.mxu0 %vm937_vm5, %v809_v5 }
  0xc7   :  { %3105 = vmatmul.mubr.msk.f32.gmra.mxu0 %vm937_vm5, %v810_v42  ;;  %v839_v42 = vpop.permute.xlu0 %838 }
  0xc8   :  { %3107 = vmatprep.mubr.msk.f32.mxu0 %vm937_vm5, %v811_v53 }
  0xcb   :  { %3108 = vmatmul.mubr.msk.f32.gmra.mxu0 %vm937_vm5, %v812_v57 }
  0xcc   :  { %3110 = vmatprep.mubr.msk.f32.mxu0 %vm937_vm5, %v813_v3  ;;  %v834_v3 = vpop.permute.xlu1 %833 }
  0xcf   :  { %3111 = vmatmul.mubr.msk.f32.gmra.mxu0 %vm937_vm5, %v814_v50 }
  0xd0   :  { %3145 = vmatprep.mubr.f32.mxu0 %v1149_v26 }
 0x173   :  { %v4387_v59 = vpop.f32.mrf.mxu0 }
 0x174   :  { %v1060_v53 = vadd.f32 %v4387_v59, %v839_v42  ;;  %v1161_v59 = vpop.permute.xlu0 %1160 }
 0x175   :  { %v4389_v30 = vpop.f32.mrf.mxu0 }
 0x176   :  { %v1055_v50 = vadd.f32 %v4389_v30, %v834_v3 }
 0x177   :  { %v4391_v15 = vpop.f32.mrf.mxu0 }
 0x178   :  { %v1070_v45 = vadd.f32 %v4391_v15, %v849_v36  ;;  %v1134_v15 = vmax.f32 %v1060_v53, 0.0 }
 0x179   :  { %v4393_v43 = vpop.f32.mrf.mxu0 }
 0x17a   :  { %v1065_v49 = vadd.f32 %v4393_v43, %v844_v63  ;;  %v1136_v57 = vmax.f32 %v1070_v45, 0.0  ;;  %v1150_v43 = vld [vmem:[%s5065_s4 + $0x8] sm:$0x3]  ;;  %s4478_s4 = sld [smem:[#allocation2 + $0x5]] }
 0x17b   :  { %v3097_v34 = vpop.f32.mrf.mxu0 }
 0x17c   :  { %v1080_v32 = vadd.f32 %v3097_v34, %v859_v11  ;;  %v1135_v26 = vmax.f32 %v1065_v49, 0.0  ;;  %v1133_v34 = vmax.f32 %v1055_v50, 0.0 }
 0x17d   :  { %v1074_v51 = vpop.f32.mrf.mxu0 }
 0x17e   :  { %v1075_v31 = vadd.f32 %v1074_v51, %v854_v56  ;;  %v1138_v4 = vmax.f32 %v1080_v32, 0.0 }
 0x17f   :  { %v3100_v17 = vpop.f32.mrf.mxu0 }
 0x180   :  { %v1090_v1 = vadd.f32 %v3100_v17, %v869_v55  ;;  %v1137_v5 = vmax.f32 %v1075_v31, 0.0 }
 0x181   :  { %v1084_v27 = vpop.f32.mrf.mxu0 }
 0x182   :  { %v1085_v6 = vadd.f32 %v1084_v27, %v864_v9  ;;  %v1140_v14 = vmax.f32 %v1090_v1, 0.0 }
 0x183   :  { %v3103_v38 = vpop.f32.mrf.mxu0 }
 0x184   :  { %v1100_v44 = vadd.f32 %v3103_v38, %v879_v19  ;;  %v1139_v18 = vmax.f32 %v1085_v6, 0.0 }
 0x185   :  { %v1094_v28 = vpop.f32.mrf.mxu0 }
 0x186   :  { %v1095_v60 = vadd.f32 %v1094_v28, %v874_v35  ;;  %v1142_v40 = vmax.f32 %v1100_v44, 0.0 }
 0x187   :  { %v3106_v13 = vpop.f32.mrf.mxu0 }
 0x188   :  { %v1110_v39 = vadd.f32 %v3106_v13, %v889_v21  ;;  %v1141_v2 = vmax.f32 %v1095_v60, 0.0 }
 0x189   :  { %v1104_v12 = vpop.f32.mrf.mxu0 }
 0x18a   :  { %v1105_v29 = vadd.f32 %v1104_v12, %v884_v23  ;;  %v1144_v48 = vmax.f32 %v1110_v39, 0.0 }
 0x18b   :  { %v3109_v0 = vpop.f32.mrf.mxu0 }
 0x18c   :  { %v1120_v7 = vadd.f32 %v3109_v0, %v899_v61  ;;  %v1143_v22 = vmax.f32 %v1105_v29, 0.0 }
 0x18d   :  { %v1114_v62 = vpop.f32.mrf.mxu0 }
 0x18e   :  { %v1115_v24 = vadd.f32 %v1114_v62, %v894_v54  ;;  %v1146_v47 = vmax.f32 %v1120_v7, 0.0  ;;  %v1258_v54 = vstv %s4402_s13 }
 0x18f   :  { %v3112_v33 = vpop.f32.mrf.mxu0 }
 0x190   :  { %v1130_v41 = vadd.f32 %v3112_v33, %v909_v10  ;;  %v1145_v16 = vmax.f32 %v1115_v24, 0.0  ;;  %v1156_v10 = vpop.permute.xlu1 %1155 }
 0x191   :  { %v1124_v8 = vpop.f32.mrf.mxu0 }
 0x192   :  { %v1148_v46 = vmax.f32 %v1130_v41, 0.0  ;;  %v1125_v52 = vadd.f32 %v1124_v8, %v904_v58 }
 0x194   :  { %v1147_v37 = vmax.f32 %v1125_v52, 0.0  ;;  %3113 = vmatprep.subr.mxu0 %v1148_v46 }
 0x195   :  { %3114 = vmatpush3.msra.mxu0 %v1148_v46 }
 0x196   :  { %3115 = vmatprep.subr.mxu0 %v1147_v37 }
 0x197   :  { %3116 = vmatpush3.msra.mxu0 %v1147_v37 }
 0x198   :  { %3117 = vmatprep.subr.mxu0 %v1146_v47 }
 0x199   :  { %3118 = vmatpush3.msra.mxu0 %v1146_v47 }
 0x19a   :  { %3119 = vmatprep.subr.mxu0 %v1145_v16 }
 0x19b   :  { %3120 = vmatpush3.msra.mxu0 %v1145_v16 }
 0x19c   :  { %3121 = vmatprep.subr.mxu0 %v1144_v48 }
 0x19d   :  { %3122 = vmatpush3.msra.mxu0 %v1144_v48 }
 0x19e   :  { %3123 = vmatprep.subr.mxu0 %v1143_v22 }
 0x19f   :  { %3124 = vmatpush3.msra.mxu0 %v1143_v22 }
 0x1a0   :  { %3125 = vmatprep.subr.mxu0 %v1142_v40 }
 0x1a1   :  { %3126 = vmatpush3.msra.mxu0 %v1142_v40 }
 0x1a2   :  { %3127 = vmatprep.subr.mxu0 %v1141_v2 }
 0x1a3   :  { %3128 = vmatpush3.msra.mxu0 %v1141_v2 }
 0x1a4   :  { %3129 = vmatprep.subr.mxu0 %v1140_v14 }
 0x1a5   :  { %3130 = vmatpush3.msra.mxu0 %v1140_v14 }
 0x1a6   :  { %3131 = vmatprep.subr.mxu0 %v1139_v18 }
 0x1a7   :  { %3132 = vmatpush3.msra.mxu0 %v1139_v18 }
 0x1a8   :  { %3133 = vmatprep.subr.mxu0 %v1138_v4 }
 0x1a9   :  { %3134 = vmatpush3.msra.mxu0 %v1138_v4 }
 0x1aa   :  { %3135 = vmatprep.subr.mxu0 %v1137_v5 }
 0x1ab   :  { %3136 = vmatpush3.msra.mxu0 %v1137_v5 }
 0x1ac   :  { %3137 = vmatprep.subr.mxu0 %v1136_v57 }
 0x1ad   :  { %3138 = vmatpush3.msra.mxu0 %v1136_v57 }
 0x1ae   :  { %3139 = vmatprep.subr.mxu0 %v1135_v26 }
 0x1af   :  { %3140 = vmatpush3.msra.mxu0 %v1135_v26 }
 0x1b0   :  { %3141 = vmatprep.subr.mxu0 %v1134_v15 }
 0x1b1   :  { %3142 = vmatpush3.msra.mxu0 %v1134_v15 }
 0x1b2   :  { %3143 = vmatprep.subr.mxu0 %v1133_v34 }
 0x1b3   :  { %3144 = vmatpush3.msra.mxu0 %v1133_v34 }
 0x1b4   :  { %3146 = vmatmul.mubr.f32.vlgmr.msra.gmra.mxu0 %v1150_v43 }
 0x274   :  { %v3147_v30 = vpop.f32.mrf.mxu0 }
 0x275   :  { %v1235_v51 = vadd.f32 %v3147_v30, %v1161_v59 }
 0x276   :  { %v1229_v17 = vpop.f32.mrf.mxu0 }
 0x277   :  { %v4404_v61 = vmax.f32 %v1235_v51, 0.0  ;;  %v1230_v27 = vadd.f32 %v1229_v17, %v1156_v10 }
 0x279   :  { %v4406_v38 = vmax.f32 %v1230_v27, 0.0  ;;  %v1240_v58 = vsel %vm58_vm0, %v4404_v61, -inf  ;;  %v1248_v28 = vsel %vm58_vm0, %v4404_v61, inf  ;;  %v1260_v29 = vmul.f32 %v1258_v54, %v4404_v61 }
 0x27b   :  { %v1241_v13 = vmax.f32 %v4406_v38, %v1240_v58  ;;  %v1249_v12 = vmin.f32 %v4406_v38, %v1248_v28  ;;  %v1259_v21 = vmul.f32 %v1258_v54, %v4406_v38  ;;  %vm1405_vm14 = vcmp.ge.f32.partialorder %v1260_v29, 0.0 }
 0x27c   :  { %v1318_v45 = vrot.slane %v1260_v29, %v3571_v20 }
 0x27d   :  { %v1242_v0 = vrot.slane %v1241_v13, 4  ;;  %v1250_v23 = vrot.slane %v1249_v12, 4  ;;  %v1270_v62 = vrot.slane %v1259_v21, %v3571_v20  ;;  %v1263_v7 = vcombine.high %v1259_v21, %v1259_v21 }
 0x27e   :  { %vm1404_vm13 = vcmp.ge.f32.partialorder %v1259_v21, 0.0  ;;  %v1319_v59 = vcombine.high %v1318_v45, %v1318_v45 }
 0x27f   :  { %v1243_v33 = vmax.f32 %v1241_v13, %v1242_v0  ;;  %v1251_v41 = vmin.f32 %v1249_v12, %v1250_v23  ;;  %v1278_v46 = vcombine.high %v1270_v62, %v1270_v62  ;;  %v1286_v24 = vrot.slane %v1270_v62, %v3571_v20 }
 0x280   :  { %v1277_v47 = vrot.slane %v1263_v7, %v3571_v20 }
 0x281   :  { %v1244_v19 = vrot.slane %v1243_v33, 2  ;;  %v1252_v8 = vrot.slane %v1251_v41, 2  ;;  %v1300_v55 = vrot.slane %v1278_v46, %v3571_v20  ;;  %v1308_v44 = vcombine.high %v1286_v24, %v1286_v24 }
 0x282   :  { %v1279_v48 = vcombine.high %v1277_v47, %v1277_v47  ;;  %v1337_v22 = vrot.slane %v1286_v24, %v3579_v25  ;;  %v1293_v6 = vrot.slane %v1277_v47, %v3571_v20 }
 0x283   :  { %v1245_v52 = vmax.f32 %v1243_v33, %v1244_v19  ;;  %v1253_v35 = vmin.f32 %v1251_v41, %v1252_v8  ;;  %v1310_v60 = vcombine.high %v1300_v55, %v1300_v55  ;;  %v1341_v11 = vrot.slane %v1300_v55, %v3579_v25 }
 0x284   :  { %v1345_v1 = vrot.slane %v1308_v44, %v3579_v25  ;;  %v1307_v2 = vrot.slane %v1279_v48, %v3571_v20  ;;  %v1384_v31 = vmul.f32 %v1337_v22, %v4406_v38  ;;  %v1385_v18 = vmul.f32 %v1337_v22, %v4404_v61 }
 0x285   :  { %v1246_v37 = vrot.slane %v1245_v52, 1  ;;  %v1254_v39 = vrot.slane %v1253_v35, 1  ;;  %v1349_v36 = vrot.slane %v1310_v60, %v3579_v25  ;;  %v1386_v63 = vmul.f32 %v1341_v11, %v4406_v38 }
 0x286   :  { %v1387_v4 = vmul.f32 %v1341_v11, %v4404_v61  ;;  %v1388_v49 = vmul.f32 %v1345_v1, %v4406_v38  ;;  %v1309_v57 = vcombine.high %v1293_v6, %v1293_v6  ;;  %v1353_v3 = vrot.slane %v1293_v6, %v3579_v25 }
 0x287   :  { %v4421_v16 = vmax.f32 %v1245_v52, %v1246_v37  ;;  %v4423_v9 = vmin.f32 %v1253_v35, %v1254_v39  ;;  %v1389_v50 = vmul.f32 %v1345_v1, %v4404_v61  ;;  %v1311_v15 = vcombine.high %v1307_v2, %v1307_v2 }
 0x288   :  { %v1390_v34 = vmul.f32 %v1349_v36, %v4406_v38  ;;  %v1357_v30 = vrot.slane %v1307_v2, %v3579_v25  ;;  %v1391_v51 = vmul.f32 %v1349_v36, %v4404_v61  ;;  %v1361_v54 = vrot.slane %v1309_v57, %v3579_v25 }
 0x289   :  { %v1406_v40 = vsel %vm1404_vm13, %v4421_v16, %v4423_v9  ;;  %v1407_v56 = vsel %vm1405_vm14, %v4421_v16, %v4423_v9  ;;  %v1393_v13 = vmul.f32 %v1353_v3, %v4404_v61  ;;  %v1365_v0 = vrot.slane %v1311_v15, %v3579_v25 }
 0x28a   :  { %v4434_v32 = vmul.f32 %v1406_v40, %v1259_v21  ;;  %v4436_v14 = vmul.f32 %v1407_v56, %v1260_v29  ;;  %v1392_v23 = vmul.f32 %v1353_v3, %v4406_v38  ;;  %v1395_v33 = vmul.f32 %v1357_v30, %v4404_v61 }
 0x28b   :  { %v1326_v8 = vrot.slane %v1318_v45, %v3571_v20  ;;  %v1397_v52 = vmul.f32 %v1361_v54, %v4404_v61  ;;  %v1394_v37 = vmul.f32 %v1357_v30, %v4406_v38  ;;  %v1399_v39 = vmul.f32 %v1365_v0, %v4404_v61 }
 0x28c   :  { %v1410_v5 = vsub.f32 %v1384_v31, %v4434_v32  ;;  %v1411_v42 = vsub.f32 %v1385_v18, %v4436_v14  ;;  %v1412_v53 = vsub.f32 %v1386_v63, %v4434_v32  ;;  %v1413_v26 = vsub.f32 %v1387_v4, %v4436_v14 }
 0x28d   :  { %v1414_v43 = vsub.f32 %v1388_v49, %v4434_v32  ;;  %v1415_v10 = vsub.f32 %v1389_v50, %v4436_v14  ;;  %v1416_v17 = vsub.f32 %v1390_v34, %v4434_v32  ;;  %v1417_v12 = vsub.f32 %v1391_v51, %v4436_v14 }
 0x28e   :  { %v1430_v27 = vmul.f32 1.442695, %v1410_v5  ;;  %v1432_v58 = vmul.f32 1.442695, %v1411_v42  ;;  %v1434_v28 = vmul.f32 1.442695, %v1412_v53  ;;  %v1419_v41 = vsub.f32 %v1393_v13, %v4436_v14 }
 0x28f   :  { %v1436_v21 = vmul.f32 1.442695, %v1413_v26  ;;  %v1438_v62 = vmul.f32 1.442695, %v1414_v43  ;;  %v1440_v19 = vmul.f32 1.442695, %v1415_v10  ;;  %v1418_v7 = vsub.f32 %v1392_v23, %v4434_v32 }
 0x290   :  { %3333 = vpow2.f32 %v1430_v27  ;;  %v1442_v46 = vmul.f32 1.442695, %v1416_v17  ;;  %v1421_v35 = vsub.f32 %v1395_v33, %v4436_v14  ;;  %v1444_v24 = vmul.f32 1.442695, %v1417_v12 }
 0x291   :  { %3335 = vpow2.f32 %v1432_v58  ;;  %v1423_v47 = vsub.f32 %v1397_v52, %v4436_v14  ;;  %v1448_v55 = vmul.f32 1.442695, %v1419_v41  ;;  %v1333_v29 = vrot.slane %v1319_v59, %v3571_v20 }
 0x292   :  { %3337 = vpow2.f32 %v1434_v28  ;;  %v1446_v44 = vmul.f32 1.442695, %v1418_v7  ;;  %v1369_v48 = vrot.slane %v1326_v8, %v3579_v25  ;;  %v1420_v60 = vsub.f32 %v1394_v37, %v4434_v32 }
 0x293   :  { %3339 = vpow2.f32 %v1436_v21  ;;  %v1452_v22 = vmul.f32 1.442695, %v1421_v35  ;;  %v1396_v11 = vmul.f32 %v1361_v54, %v4406_v38  ;;  %v1425_v1 = vsub.f32 %v1399_v39, %v4436_v14 }
 0x294   :  { %3341 = vpow2.f32 %v1438_v62  ;;  %v1456_v40 = vmul.f32 1.442695, %v1423_v47  ;;  %v1373_v56 = vrot.slane %v1333_v29, %v3579_v25  ;;  %v1398_v6 = vmul.f32 %v1365_v0, %v4406_v38  ;;  %v3221_v29 = vld [vmem:[%s5067_s6] sm:$0xff]  }
 0x295   :  { %3343 = vpow2.f32 %v1440_v19  ;;  %v1401_v2 = vmul.f32 %v1369_v48, %v4404_v61  ;;  %v1422_v36 = vsub.f32 %v1396_v11, %v4434_v32  ;;  %v1450_v31 = vmul.f32 1.442695, %v1420_v60  ;;  %3150 = vmatprep.mubr.msk.bf16.mxu0 %vm937_vm5, %v3221_v29 }
 0x296   :  { %3345 = vpow2.f32 %v1442_v46  ;;  %v1460_v45 = vmul.f32 1.442695, %v1425_v1  ;;  %v1403_v49 = vmul.f32 %v1373_v56, %v4404_v61  ;;  %v1424_v42 = vsub.f32 %v1398_v6, %v4434_v32 }
 0x297   :  { %3347 = vpow2.f32 %v1444_v24  ;;  %v1427_v63 = vsub.f32 %v1401_v2, %v4436_v14  ;;  %v1454_v53 = vmul.f32 1.442695, %v1422_v36  ;;  %v1400_v50 = vmul.f32 %v1369_v48, %v4406_v38 }
 0x298   :  { %3349 = vpow2.f32 %v1448_v55  ;;  %v1429_v34 = vsub.f32 %v1403_v49, %v4436_v14  ;;  %v1615_v17 = vstv %s4478_s4  ;;  %v1458_v28 = vmul.f32 1.442695, %v1424_v42 }
 0x299   :  { %3351 = vpow2.f32 %v1446_v44  ;;  %v1464_v43 = vmul.f32 1.442695, %v1427_v63  ;;  %v1426_v58 = vsub.f32 %v1400_v50, %v4434_v32  ;;  %v1402_v13 = vmul.f32 %v1373_v56, %v4406_v38 }
 0x29a   :  { %3353 = vpow2.f32 %v1452_v22  ;;  %v1616_v21 = vmul.f32 %v1615_v17, %v4406_v38  ;;  %v1468_v0 = vmul.f32 1.442695, %v1429_v34  ;;  %v1617_v56 = vmul.f32 %v1615_v17, %v4404_v61 }
 0x29b   :  { %3355 = vpow2.f32 %v1456_v40  ;;  %v1428_v8 = vsub.f32 %v1402_v13, %v4434_v32  ;;  %v1462_v7 = vmul.f32 1.442695, %v1426_v58 }
 0x29c   :  { %3357 = vpow2.f32 %v1450_v31  ;;  %v1627_v39 = vrot.slane %v1616_v21, %v3571_v20  ;;  %v1620_v48 = vcombine.high %v1616_v21, %v1616_v21  ;;  %vm1761_vm15 = vcmp.ge.f32.partialorder %v1616_v21, 0.0 }
 0x29d   :  { %v4482_v18 = vpop.eup %3333  ;;  %3359 = vpow2.f32 %v1460_v45  ;;  %v1466_v32 = vmul.f32 1.442695, %v1428_v8  ;;  %v1763_v49 = vsel %vm1761_vm15, %v4421_v16, %v4423_v9  ;;  %vm1762_vm1 = vcmp.ge.f32.partialorder %v1617_v56, 0.0 }
 0x29e   :  { %v4485_v4 = vpop.eup %3335  ;;  %3361 = vpow2.f32 %v1454_v53  ;;  %v1635_v11 = vcombine.high %v1627_v39, %v1627_v39  ;;  %v1643_v6 = vrot.slane %v1627_v39, %v3571_v20  ;;  %v1634_v36 = vrot.slane %v1620_v48, %v3571_v20 }
 0x29f   :  { %v4488_v5 = vpop.eup %3337  ;;  %v1479_v57 = vsel %vm58_vm0, %v4485_v4, 0.0  ;;  %3363 = vpow2.f32 %v1464_v43  ;;  %v1764_v50 = vsel %vm1762_vm1, %v4421_v16, %v4423_v9  ;;  %v4563_v34 = vmul.f32 %v1763_v49, %v1616_v21 }
 0x2a0   :  { %v4493_v3 = vpop.eup %3339  ;;  %v1470_v26 = vadd.f32 %v4488_v5, %v4482_v18  ;;  %3365 = vpow2.f32 %v1458_v28  ;;  %v1657_v45 = vrot.slane %v1635_v11, %v3571_v20  ;;  %v1665_v28 = vcombine.high %v1643_v6, %v1643_v6 }
 0x2a1   :  { %v4498_v15 = vpop.eup %3341  ;;  %v1480_v59 = vsel %vm58_vm0, %v4493_v3, 0.0  ;;  %3367 = vpow2.f32 %v1468_v0  ;;  %v4572_v13 = vmul.f32 %v1764_v50, %v1617_v56  ;;  %v1675_v16 = vrot.slane %v1617_v56, %v3571_v20 }
 0x2a2   :  { %v4503_v30 = vpop.eup %3343  ;;  %v1471_v51 = vadd.f32 %v4498_v15, %v1470_v26  ;;  %v1481_v10 = vadd.f32 %v1480_v59, %v1479_v57  ;;  %3369 = vpow2.f32 %v1462_v7  ;;  %v1694_v57 = vrot.slane %v1643_v6, %v3579_v25 }
 0x2a3   :  { %v4507_v27 = vpop.eup %3345  ;;  %v1482_v14 = vsel %vm58_vm0, %v4503_v30, 0.0  ;;  %3371 = vpow2.f32 %v1466_v32  ;;  %v1667_v21 = vcombine.high %v1657_v45, %v1657_v45 }
 0x2a4   :  { %v4512_v54 = vpop.eup %3347  ;;  %v1483_v12 = vadd.f32 %v1482_v14, %v1481_v10  ;;  %v1472_v23 = vadd.f32 %v4507_v27, %v1471_v51  ;;  %v1636_v51 = vcombine.high %v1634_v36, %v1634_v36  ;;  %v1698_v10 = vrot.slane %v1657_v45, %v3579_v25 }
 0x2a5   :  { %v1484_v62 = vsel %vm58_vm0, %v4512_v54, 0.0  ;;  %v4519_v33 = vpop.eup %3349  ;;  %v1741_v14 = vmul.f32 %v1694_v57, %v4406_v38  ;;  %v1742_v0 = vmul.f32 %v1694_v57, %v4404_v61  ;;  %v1706_v32 = vrot.slane %v1667_v21, %v3579_v25 }
 0x2a6   :  { %v1485_v41 = vadd.f32 %v1484_v62, %v1483_v12  ;;  %v4521_v19 = vpop.eup %3351  ;;  %v1486_v46 = vsel %vm58_vm0, %v4519_v33, 0.0  ;;  %v1650_v12 = vrot.slane %v1634_v36, %v3571_v20  ;;  %v1664_v8 = vrot.slane %v1636_v51, %v3571_v20 }
 0x2a7   :  { %v4526_v52 = vpop.eup %3353  ;;  %v1473_v24 = vadd.f32 %v4521_v19, %v1472_v23  ;;  %v1767_v23 = vsub.f32 %v1741_v14, %v4563_v34  ;;  %v1743_v7 = vmul.f32 %v1698_v10, %v4406_v38 }
 0x2a8   :  { %v1487_v35 = vadd.f32 %v1486_v46, %v1485_v41  ;;  %v1488_v37 = vsel %vm58_vm0, %v4526_v52, 0.0  ;;  %v4532_v47 = vpop.eup %3355  ;;  %v1668_v11 = vcombine.high %v1664_v8, %v1664_v8  ;;  %v1710_v56 = vrot.slane %v1650_v12, %v3579_v25 }
 0x2a9   :  { %v4537_v44 = vpop.eup %3357  ;;  %v1490_v22 = vsel %vm58_vm0, %v4532_v47, 0.0  ;;  %v1769_v39 = vsub.f32 %v1743_v7, %v4563_v34  ;;  %v1787_v48 = vmul.f32 1.442695, %v1767_v23 }
 0x2aa   :  { %v1489_v55 = vadd.f32 %v1488_v37, %v1487_v35  ;;  %v1474_v60 = vadd.f32 %v4537_v44, %v1473_v24  ;;  %v4543_v1 = vpop.eup %3359  ;;  %v1702_v35 = vrot.slane %v1665_v28, %v3579_v25  ;;  %v1744_v24 = vmul.f32 %v1698_v10, %v4404_v61 }
 0x2ab   :  { %v4547_v2 = vpop.eup %3361  ;;  %v1492_v63 = vsel %vm58_vm0, %v4543_v1, 0.0  ;;  %v1768_v37 = vsub.f32 %v1742_v0, %v4572_v13  ;;  %v1791_v49 = vmul.f32 1.442695, %v1769_v39  ;;  %v1722_v10 = vrot.slane %v1668_v11, %v3579_v25 }
 0x2ac   :  { %v1491_v40 = vadd.f32 %v1490_v22, %v1489_v55  ;;  %v1475_v31 = vadd.f32 %v4547_v2, %v1474_v60  ;;  %v4556_v42 = vpop.eup %3363  ;;  %v1770_v29 = vsub.f32 %v1744_v24, %v4572_v13  ;;  %v1666_v22 = vcombine.high %v1650_v12, %v1650_v12 }
 0x2ad   :  { %v4561_v26 = vpop.eup %3365  ;;  %v1494_v59 = vsel %vm58_vm0, %v4556_v42, 0.0  ;;  %v1745_v6 = vmul.f32 %v1702_v35, %v4406_v38  ;;  %v1789_v36 = vmul.f32 1.442695, %v1768_v37  ;;  %v1746_v45 = vmul.f32 %v1702_v35, %v4404_v61 }
 0x2ae   :  { %v1493_v53 = vadd.f32 %v1492_v63, %v1491_v40  ;;  %v1476_v43 = vadd.f32 %v4561_v26, %v1475_v31  ;;  %v4569_v17 = vpop.eup %3367  ;;  %v1676_v40 = vcombine.high %v1675_v16, %v1675_v16  ;;  %v1683_v31 = vrot.slane %v1675_v16, %v3571_v20 }
 0x2af   :  { %v4575_v9 = vpop.eup %3369  ;;  %v1496_v41 = vsel %vm58_vm0, %v4569_v17, 0.0  ;;  %v1714_v63 = vrot.slane %v1664_v8, %v3579_v25  ;;  %v1771_v57 = vsub.f32 %v1745_v6, %v4563_v34  ;;  %v1793_v50 = vmul.f32 1.442695, %v1770_v29 }
 0x2b0   :  { %v1495_v58 = vadd.f32 %v1494_v59, %v1493_v53  ;;  %v1477_v62 = vadd.f32 %v4575_v9, %v1476_v43  ;;  %v4589_v55 = vpop.eup %3371  ;;  %v1747_v53 = vmul.f32 %v1706_v32, %v4406_v38  ;;  %v1718_v43 = vrot.slane %v1666_v22, %v3579_v25 }
 0x2b1   :  { %v1748_v59 = vmul.f32 %v1706_v32, %v4404_v61  ;;  %v1772_v51 = vsub.f32 %v1746_v45, %v4572_v13  ;;  %v1690_v14 = vrot.slane %v1676_v40, %v3571_v20  ;;  %v1750_v16 = vmul.f32 %v1710_v56, %v4404_v61 }
 0x2b2   :  { %v1497_v46 = vadd.f32 %v1496_v41, %v1495_v58  ;;  %v1478_v60 = vadd.f32 %v4589_v55, %v1477_v62  ;;  %v1749_v58 = vmul.f32 %v1710_v56, %v4406_v38  ;;  %v1773_v28 = vsub.f32 %v1747_v53, %v4563_v34 }
 0x2b3   :  { %v1774_v12 = vsub.f32 %v1748_v59, %v4572_v13  ;;  %v1751_v21 = vmul.f32 %v1714_v63, %v4406_v38  ;;  %v1795_v23 = vmul.f32 1.442695, %v1771_v57  ;;  %v1726_v62 = vrot.slane %v1683_v31, %v3579_v25 }
 0x2b4   :  { %3373 = vrcp.f32 %v1497_v46  ;;  %v1775_v0 = vsub.f32 %v1749_v58, %v4563_v34  ;;  %v1752_v41 = vmul.f32 %v1714_v63, %v4404_v61  ;;  %v1776_v8 = vsub.f32 %v1750_v16, %v4572_v13 }
 0x2b5   :  { %3375 = vpow2.f32 %v1787_v48  ;;  %v1797_v7 = vmul.f32 1.442695, %v1772_v51  ;;  %v1753_v46 = vmul.f32 %v1718_v43, %v4406_v38  ;;  %v1755_v35 = vmul.f32 %v1722_v10, %v4406_v38 }
 0x2b6   :  { %3377 = vrcp.f32 %v1478_v60  ;;  %v1777_v24 = vsub.f32 %v1751_v21, %v4563_v34  ;;  %v1799_v37 = vmul.f32 1.442695, %v1773_v28  ;;  %v1754_v39 = vmul.f32 %v1718_v43, %v4404_v61 }
 0x2b7   :  { %3379 = vpow2.f32 %v1789_v36  ;;  %v1756_v32 = vmul.f32 %v1722_v10, %v4404_v61  ;;  %v1778_v29 = vsub.f32 %v1752_v41, %v4572_v13  ;;  %v1801_v48 = vmul.f32 1.442695, %v1774_v12 }
 0x2b8   :  { %3381 = vpow2.f32 %v1791_v49  ;;  %v1730_v60 = vrot.slane %v1690_v14, %v3579_v25  ;;  %v1779_v22 = vsub.f32 %v1753_v46, %v4563_v34  ;;  %v1803_v11 = vmul.f32 1.442695, %v1775_v0 }
 0x2b9   :  { %3383 = vpow2.f32 %v1793_v50  ;;  %v1780_v40 = vsub.f32 %v1754_v39, %v4572_v13  ;;  %v1805_v56 = vmul.f32 1.442695, %v1776_v8  ;;  %v1757_v6 = vmul.f32 %v1726_v62, %v4406_v38 }
 0x2ba   :  { %3385 = vpow2.f32 %v1795_v23  ;;  %v1781_v36 = vsub.f32 %v1755_v35, %v4563_v34  ;;  %v1807_v31 = vmul.f32 1.442695, %v1777_v24  ;;  %v1758_v45 = vmul.f32 %v1726_v62, %v4404_v61 }
 0x2bb   :  { %3387 = vpow2.f32 %v1797_v7  ;;  %v1782_v49 = vsub.f32 %v1756_v32, %v4572_v13  ;;  %v1809_v25 = vmul.f32 1.442695, %v1778_v29  ;;  %v1759_v53 = vmul.f32 %v1730_v60, %v4406_v38 }
 0x2bc   :  { %3389 = vpow2.f32 %v1799_v37  ;;  %v1783_v57 = vsub.f32 %v1757_v6, %v4563_v34  ;;  %v1811_v50 = vmul.f32 1.442695, %v1779_v22  ;;  %v1760_v59 = vmul.f32 %v1730_v60, %v4404_v61 }
 0x2bd   :  { %3391 = vpow2.f32 %v1801_v48  ;;  %v1784_v51 = vsub.f32 %v1758_v45, %v4572_v13  ;;  %v1813_v10 = vmul.f32 1.442695, %v1780_v40  ;;  %v1815_v14 = vmul.f32 1.442695, %v1781_v36 }
 0x2be   :  { %3393 = vpow2.f32 %v1803_v11  ;;  %v1785_v12 = vsub.f32 %v1759_v53, %v4563_v34  ;;  %v1786_v21 = vsub.f32 %v1760_v59, %v4572_v13  ;;  %v1817_v0 = vmul.f32 1.442695, %v1782_v49 }
 0x2bf   :  { %3395 = vpow2.f32 %v1805_v56  ;;  %v1819_v62 = vmul.f32 1.442695, %v1783_v57  ;;  %v1821_v7 = vmul.f32 1.442695, %v1784_v51 }
 0x2c0   :  { %3397 = vpow2.f32 %v1807_v31  ;;  %v1823_v35 = vmul.f32 1.442695, %v1785_v12  ;;  %v1825_v24 = vmul.f32 1.442695, %v1786_v21 }
 0x2c1   :  { %v3374_v63 = vpop.eup %3373  ;;  %3399 = vpow2.f32 %v1809_v25 }
 0x2c2   :  { %v4630_v43 = vpop.eup %3375  ;;  %v4635_v28 = vmul.f32 %v3374_v63, %v4404_v61  ;;  %3401 = vpow2.f32 %v1811_v50 }
 0x2c3   :  { %v3378_v58 = vpop.eup %3377  ;;  %3403 = vpow2.f32 %v1813_v10 }
 0x2c4   :  { %v4637_v16 = vpop.eup %3379  ;;  %v4646_v8 = vmul.f32 %v3378_v58, %v4406_v38  ;;  %v1503_v46 = vmul.f32 %v4485_v4, %v4635_v28  ;;  %v1505_v34 = vmul.f32 %v4493_v3, %v4635_v28  ;;  %v1507_v13 = vmul.f32 %v4503_v30, %v4635_v28 }
 0x2c5   :  { %v4641_v23 = vpop.eup %3381  ;;  %3405 = vpow2.f32 %v1815_v14  ;;  %v1836_v37 = vsel %vm58_vm0, %v4637_v16, 0.0  ;;  %v1509_v39 = vmul.f32 %v4512_v54, %v4635_v28  ;;  %v1511_v48 = vmul.f32 %v4519_v33, %v4635_v28 }
 0x2c6   :  { %v4643_v41 = vpop.eup %3383  ;;  %3407 = vpow2.f32 %v1817_v0  ;;  %v1827_v4 = vadd.f32 %v4641_v23, %v4630_v43  ;;  %v1502_v30 = vmul.f32 %v4482_v18, %v4646_v8  ;;  %v1504_v29 = vmul.f32 %v4488_v5, %v4646_v8 }
 0x2c7   :  { %3409 = vpow2.f32 %v1819_v62  ;;  %v1837_v3 = vsel %vm58_vm0, %v4643_v41, 0.0  ;;  %v4662_v32 = vpop.eup %3385  ;;  %v1513_v54 = vmul.f32 %v4526_v52, %v4635_v28  ;;  %v1515_v22 = vmul.f32 %v4532_v47, %v4635_v28 }
 0x2c8   :  { %v4672_v60 = vpop.eup %3387  ;;  %v1522_v11 = vsel %vm58_vm0, %v1503_v46, 0.0  ;;  %v1530_v40 = vsel %vm58_vm0, %v1505_v34, 0.0  ;;  %v1538_v18 = vsel %vm58_vm0, %v1507_v13, 0.0  ;;  %v1506_v5 = vmul.f32 %v4498_v15, %v4646_v8 }
 0x2c9   :  { %v4679_v56 = vpop.eup %3389  ;;  %v1508_v33 = vmul.f32 %v4507_v27, %v4646_v8  ;;  %v1510_v52 = vmul.f32 %v4521_v19, %v4646_v8  ;;  %v1517_v47 = vmul.f32 %v4543_v1, %v4635_v28  ;;  %v1512_v36 = vmul.f32 %v4537_v44, %v4646_v8 }
 0x2ca   :  { %v4689_v6 = vpop.eup %3391  ;;  %v1514_v31 = vmul.f32 %v4547_v2, %v4646_v8  ;;  %v1516_v15 = vmul.f32 %v4561_v26, %v4646_v8  ;;  %v1546_v63 = vsel %vm58_vm0, %v1509_v39, 0.0  ;;  %v1523_v45 = vadd.f32 %v1522_v11, %v1502_v30 }
 0x2cb   :  { %v4698_v27 = vpop.eup %3393  ;;  %v1531_v19 = vadd.f32 %v1530_v40, %v1504_v29  ;;  %v1539_v49 = vadd.f32 %v1538_v18, %v1506_v5  ;;  %v1554_v1 = vsel %vm58_vm0, %v1511_v48, 0.0  ;;  %v1562_v53 = vsel %vm58_vm0, %v1513_v54, 0.0 }
 0x2cc   :  { %v4701_v25 = vpop.eup %3395  ;;  %v1570_v44 = vsel %vm58_vm0, %v1515_v22, 0.0  ;;  %3411 = vpow2.f32 %v1821_v7  ;;  %v1828_v2 = vadd.f32 %v4662_v32, %v1827_v4  ;;  %v1547_v26 = vadd.f32 %v1546_v63, %v1508_v33 }
 0x2cd   :  { %v4706_v57 = vpop.eup %3397  ;;  %v1578_v50 = vsel %vm58_vm0, %v1517_v47, 0.0  ;;  %3413 = vpow2.f32 %v1823_v35  ;;  %v1838_v59 = vadd.f32 %v1837_v3, %v1836_v37  ;;  %v1555_v10 = vadd.f32 %v1554_v1, %v1510_v52 }
 0x2ce   :  { %v4709_v51 = vpop.eup %3399  ;;  %3415 = vpow2.f32 %v1825_v24  ;;  %v1829_v58 = vadd.f32 %v4679_v56, %v1828_v2  ;;  %v1839_v14 = vsel %vm58_vm0, %v4672_v60, 0.0  ;;  %v1518_v21 = vmul.f32 %v4575_v9, %v4646_v8 }
 0x2cf   :  { %v4714_v12 = vpop.eup %3401  ;;  %v1563_v0 = vadd.f32 %v1562_v53, %v1512_v36  ;;  %v1571_v62 = vadd.f32 %v1570_v44, %v1514_v31  ;;  %v1840_v7 = vadd.f32 %v1839_v14, %v1838_v59  ;;  %v1524_v34 = vrot.slane %v1523_v45, 4 }
 0x2d0   :  { %v4718_v46 = vpop.eup %3403  ;;  %v1579_v13 = vadd.f32 %v1578_v50, %v1516_v15  ;;  %v1830_v35 = vadd.f32 %v4698_v27, %v1829_v58  ;;  %v1841_v24 = vsel %vm58_vm0, %v4689_v6, 0.0  ;;  %v1519_v39 = vmul.f32 %v4556_v42, %v4635_v28 }
 0x2d1   :  { %v1532_v4 = vrot.slane %v1531_v19, 4  ;;  %v1540_v3 = vrot.slane %v1539_v49, 4  ;;  %v1842_v9 = vadd.f32 %v1841_v24, %v1840_v7  ;;  %v1548_v29 = vrot.slane %v1547_v26, 4 }
 0x2d2   :  { %v4723_v37 = vpop.eup %3405  ;;  %v1556_v48 = vrot.slane %v1555_v10, 4  ;;  %v1831_v54 = vadd.f32 %v4706_v57, %v1830_v35  ;;  %v1843_v22 = vsel %vm58_vm0, %v4701_v25, 0.0  ;;  %v1521_v40 = vmul.f32 %v4569_v17, %v4635_v28 }
 0x2d3   :  { %v4727_v30 = vpop.eup %3407  ;;  %v1564_v18 = vrot.slane %v1563_v0, 4  ;;  %v1572_v5 = vrot.slane %v1571_v62, 4  ;;  %v1844_v42 = vadd.f32 %v1843_v22, %v1842_v9  ;;  %v1525_v33 = vadd.f32 %v1524_v34, %v1523_v45 }
 0x2d4   :  { %v4732_v11 = vpop.eup %3409  ;;  %v1580_v52 = vrot.slane %v1579_v13, 4  ;;  %v1832_v47 = vadd.f32 %v4714_v12, %v1831_v54  ;;  %v1845_v36 = vsel %vm58_vm0, %v4709_v51, 0.0  ;;  %v1533_v31 = vadd.f32 %v1532_v4, %v1531_v19 }
 0x2d5   :  { %v1541_v15 = vadd.f32 %v1540_v3, %v1539_v49  ;;  %v1586_v63 = vsel %vm58_vm0, %v1519_v39, 0.0  ;;  %v1846_v1 = vadd.f32 %v1845_v36, %v1844_v42  ;;  %v1549_v53 = vadd.f32 %v1548_v29, %v1547_v26 }
 0x2d6   :  { %v1557_v44 = vadd.f32 %v1556_v48, %v1555_v10  ;;  %v1833_v2 = vadd.f32 %v4723_v37, %v1832_v47  ;;  %v1847_v17 = vsel %vm58_vm0, %v4718_v46, 0.0  ;;  %v1520_v28 = vmul.f32 %v4589_v55, %v4646_v8 }
 0x2d7   :  { %v1565_v45 = vadd.f32 %v1564_v18, %v1563_v0  ;;  %v1573_v50 = vadd.f32 %v1572_v5, %v1571_v62  ;;  %v1848_v59 = vadd.f32 %v1847_v17, %v1846_v1  ;;  %v1581_v58 = vadd.f32 %v1580_v52, %v1579_v13 }
 0x2d8   :  { %v1587_v14 = vadd.f32 %v1586_v63, %v1518_v21  ;;  %v1834_v19 = vadd.f32 %v4732_v11, %v1833_v2  ;;  %v1849_v49 = vsel %vm58_vm0, %v4727_v30, 0.0  ;;  %v1526_v10 = vrot.slane %v1525_v33, 2 }
 0x2d9   :  { %v4748_v26 = vpop.eup %3411  ;;  %v1534_v7 = vrot.slane %v1533_v31, 2  ;;  %v1594_v34 = vsel %vm58_vm0, %v1521_v40, 0.0  ;;  %v1850_v35 = vadd.f32 %v1849_v49, %v1848_v59  ;;  %v1542_v55 = vrot.slane %v1541_v15, 2 }
 0x2da   :  { %v4751_v24 = vpop.eup %3413  ;;  %v1550_v8 = vrot.slane %v1549_v53, 2  ;;  %v1558_v0 = vrot.slane %v1557_v44, 2  ;;  %v1851_v21 = vsel %vm58_vm0, %v4748_v26, 0.0  ;;  %v1566_v13 = vrot.slane %v1565_v45, 2 }
 0x2db   :  { %v4755_v62 = vpop.eup %3415  ;;  %v1574_v39 = vrot.slane %v1573_v50, 2  ;;  %v1835_v4 = vadd.f32 %v4751_v24, %v1834_v19  ;;  %v1852_v3 = vadd.f32 %v1851_v21, %v1850_v35  ;;  %v1582_v9 = vrot.slane %v1581_v58, 2 }
 0x2dc   :  { %v1588_v29 = vrot.slane %v1587_v14, 4  ;;  %v1595_v48 = vadd.f32 %v1594_v34, %v1520_v28  ;;  %v1853_v54 = vsel %vm58_vm0, %v4755_v62, 0.0  ;;  %v1527_v40 = vadd.f32 %v1526_v10, %v1525_v33 }
 0x2dd   :  { %v1854_v22 = vadd.f32 %v1853_v54, %v1852_v3  ;;  %3417 = vrcp.f32 %v1835_v4  ;;  %v1535_v18 = vadd.f32 %v1534_v7, %v1533_v31  ;;  %v1543_v5 = vadd.f32 %v1542_v55, %v1541_v15 }
 0x2de   :  { %v1551_v42 = vadd.f32 %v1550_v8, %v1549_v53  ;;  %v1559_v52 = vadd.f32 %v1558_v0, %v1557_v44  ;;  %v1567_v47 = vadd.f32 %v1566_v13, %v1565_v45  ;;  %v1575_v36 = vadd.f32 %v1574_v39, %v1573_v50 }
 0x2df   :  { %3419 = vrcp.f32 %v1854_v22  ;;  %v1583_v63 = vadd.f32 %v1582_v9, %v1581_v58  ;;  %v1589_v1 = vadd.f32 %v1588_v29, %v1587_v14  ;;  %v1596_v2 = vrot.slane %v1595_v48, 4 }
 0x2e0   :  { %v1528_v17 = vrot.slane %v1527_v40, 1  ;;  %v1536_v59 = vrot.slane %v1535_v18, 1  ;;  %v1544_v28 = vrot.slane %v1543_v5, 1  ;;  %v1552_v19 = vrot.slane %v1551_v42, 1 }
 0x2e1   :  { %v1560_v49 = vrot.slane %v1559_v52, 1  ;;  %v1568_v34 = vrot.slane %v1567_v47, 1  ;;  %v1576_v35 = vrot.slane %v1575_v36, 1  ;;  %v1584_v33 = vrot.slane %v1583_v63, 1 }
 0x2e2   :  { %v1590_v31 = vrot.slane %v1589_v1, 2  ;;  %v1597_v15 = vadd.f32 %v1596_v2, %v1595_v48  ;;  %v1529_v10 = vadd.f32 %v1528_v17, %v1527_v40  ;;  %v1537_v53 = vadd.f32 %v1536_v59, %v1535_v18 }
 0x2e3   :  { %v1545_v44 = vadd.f32 %v1544_v28, %v1543_v5  ;;  %v1553_v45 = vadd.f32 %v1552_v19, %v1551_v42  ;;  %v1561_v7 = vadd.f32 %v1560_v49, %v1559_v52  ;;  %v1569_v50 = vadd.f32 %v1568_v34, %v1567_v47 }
 0x2e4   :  { %v4760_v58 = vstv %s2958_s1  ;;  %v1577_v14 = vadd.f32 %v1576_v35, %v1575_v36  ;;  %v1585_v55 = vadd.f32 %v1584_v33, %v1583_v63  ;;  %v4762_v8 = vadd.f32 %v1590_v31, %v1589_v1 }
 0x2e5   :  { %v1598_v0 = vrot.slane %v1597_v15, 2  ;;  %v4765_v13 = vmul.f32 %v4760_v58, %v1529_v10  ;;  %v4768_v39 = vmul.f32 %v4760_v58, %v1537_v53  ;;  %v4771_v4 = vmul.f32 %v4760_v58, %v1545_v44 }
 0x2e6   :  { %v4773_v3 = vstv %s2960_s14  ;;  %v4776_v9 = vmul.f32 %v4760_v58, %v1553_v45  ;;  %v4779_v29 = vmul.f32 %v4760_v58, %v1561_v7  ;;  %v4782_v48 = vmul.f32 %v4760_v58, %v1569_v50 }
 0x2e7   :  { %v1592_v40 = vrot.slane %v4762_v8, 1  ;;  %v4786_v18 = vadd.f32 %v1598_v0, %v1597_v15  ;;  %v4789_v5 = vmul.f32 %v4760_v58, %v1577_v14  ;;  %v4792_v42 = vmul.f32 %v4760_v58, %v1585_v55 }
 0x2ea   :  { %v3418_v21 = vpop.eup %3417 }
 0x2eb   :  { %v1857_v54 = vmul.f32 %v3418_v21, %v4406_v38 }
 0x2ec   :  { %v3420_v22 = vpop.eup %3419 }
 0x2ed   :  { %v1858_v52 = vmul.f32 %v3420_v22, %v4404_v61  ;;  %v1859_v47 = vmul.f32 %v4630_v43, %v1857_v54  ;;  %v1861_v36 = vmul.f32 %v4641_v23, %v1857_v54  ;;  %v1863_v63 = vmul.f32 %v4662_v32, %v1857_v54 }
 0x2ee   :  { %v1865_v38 = vmul.f32 %v4679_v56, %v1857_v54  ;;  %v1867_v1 = vmul.f32 %v4698_v27, %v1857_v54  ;;  %v1869_v2 = vmul.f32 %v4706_v57, %v1857_v54  ;;  %v1871_v17 = vmul.f32 %v4714_v12, %v1857_v54 }
 0x2ef   :  { %v1860_v59 = vmul.f32 %v4637_v16, %v1858_v52  ;;  %v1862_v28 = vmul.f32 %v4643_v41, %v1858_v52  ;;  %v1864_v61 = vmul.f32 %v4672_v60, %v1858_v52  ;;  %v1866_v43 = vmul.f32 %v4689_v6, %v1858_v52 }
 0x2f0   :  { %v1868_v23 = vmul.f32 %v4701_v25, %v1858_v52  ;;  %v1870_v32 = vmul.f32 %v4709_v51, %v1858_v52  ;;  %v1872_v56 = vmul.f32 %v4718_v46, %v1858_v52  ;;  %v1873_v27 = vmul.f32 %v4723_v37, %v1857_v54 }
 0x2f1   :  { %v1874_v57 = vmul.f32 %v4727_v30, %v1858_v52  ;;  %v4812_v12 = vmul.f32 %v4732_v11, %v1857_v54  ;;  %v4815_v16 = vmul.f32 %v4748_v26, %v1858_v52  ;;  %v4818_v41 = vmul.f32 %v4751_v24, %v1857_v54 }
 0x2f2   :  { %v1878_v60 = vmul.f32 %v4755_v62, %v1858_v52  ;;  %v1879_v6 = vsel %vm58_vm0, %v1860_v59, 0.0  ;;  %v1887_v25 = vsel %vm58_vm0, %v1862_v28, 0.0  ;;  %v1895_v51 = vsel %vm58_vm0, %v1864_v61, 0.0 }
 0x2f3   :  { %v1880_v46 = vadd.f32 %v1879_v6, %v1859_v47  ;;  %v1888_v37 = vadd.f32 %v1887_v25, %v1861_v36  ;;  %v1896_v30 = vadd.f32 %v1895_v51, %v1863_v63  ;;  %v1903_v11 = vsel %vm58_vm0, %v1866_v43, 0.0 }
 0x2f4   :  { %v1904_v19 = vadd.f32 %v1903_v11, %v1865_v38  ;;  %v1911_v26 = vsel %vm58_vm0, %v1868_v23, 0.0  ;;  %v1919_v49 = vsel %vm58_vm0, %v1870_v32, 0.0  ;;  %v1927_v24 = vsel %vm58_vm0, %v1872_v56, 0.0 }
 0x2f5   :  { %v1881_v34 = vrot.slane %v1880_v46, 4  ;;  %v1889_v62 = vrot.slane %v1888_v37, 4  ;;  %v1897_v35 = vrot.slane %v1896_v30, 4  ;;  %v1912_v33 = vadd.f32 %v1911_v26, %v1867_v1 }
 0x2f6   :  { %v1905_v31 = vrot.slane %v1904_v19, 4  ;;  %v1920_v15 = vadd.f32 %v1919_v49, %v1869_v2  ;;  %v1928_v10 = vadd.f32 %v1927_v24, %v1871_v17  ;;  %v1935_v53 = vsel %vm58_vm0, %v1874_v57, 0.0 }
 0x2f7   :  { %v1882_v44 = vadd.f32 %v1881_v34, %v1880_v46  ;;  %v1890_v45 = vadd.f32 %v1889_v62, %v1888_v37  ;;  %v1898_v7 = vadd.f32 %v1897_v35, %v1896_v30  ;;  %v1913_v50 = vrot.slane %v1912_v33, 4 }
 0x2f8   :  { %v1906_v14 = vadd.f32 %v1905_v31, %v1904_v19  ;;  %v1921_v55 = vrot.slane %v1920_v15, 4  ;;  %v1929_v0 = vrot.slane %v1928_v10, 4  ;;  %v1936_v21 = vadd.f32 %v1935_v53, %v1873_v27 }
 0x2f9   :  { %v1883_v54 = vrot.slane %v1882_v44, 2  ;;  %v1891_v22 = vrot.slane %v1890_v45, 2  ;;  %v1899_v52 = vrot.slane %v1898_v7, 2  ;;  %v1914_v47 = vadd.f32 %v1913_v50, %v1912_v33 }
 0x2fa   :  { %v1907_v36 = vrot.slane %v1906_v14, 2  ;;  %v1922_v63 = vadd.f32 %v1921_v55, %v1920_v15  ;;  %v1930_v38 = vadd.f32 %v1929_v0, %v1928_v10  ;;  %v1937_v1 = vrot.slane %v1936_v21, 4 }
 0x2fb   :  { %v1884_v2 = vadd.f32 %v1883_v54, %v1882_v44  ;;  %v1892_v17 = vadd.f32 %v1891_v22, %v1890_v45  ;;  %v1900_v59 = vadd.f32 %v1899_v52, %v1898_v7  ;;  %v1915_v28 = vrot.slane %v1914_v47, 2 }
 0x2fc   :  { %v1908_v61 = vadd.f32 %v1907_v36, %v1906_v14  ;;  %v1923_v43 = vrot.slane %v1922_v63, 2  ;;  %v1931_v23 = vrot.slane %v1930_v38, 2  ;;  %v1938_v32 = vadd.f32 %v1937_v1, %v1936_v21 }
 0x2fd   :  { %v1885_v56 = vrot.slane %v1884_v2, 1  ;;  %v1893_v57 = vrot.slane %v1892_v17, 1  ;;  %v1901_v6 = vrot.slane %v1900_v59, 1  ;;  %v1916_v27 = vadd.f32 %v1915_v28, %v1914_v47 }
 0x2fe   :  { %v1909_v25 = vrot.slane %v1908_v61, 1  ;;  %v1924_v51 = vadd.f32 %v1923_v43, %v1922_v63  ;;  %v1932_v46 = vadd.f32 %v1931_v23, %v1930_v38  ;;  %v1939_v37 = vrot.slane %v1938_v32, 2 }
 0x2ff   :  { %v1886_v30 = vadd.f32 %v1885_v56, %v1884_v2  ;;  %v1894_v11 = vadd.f32 %v1893_v57, %v1892_v17  ;;  %v1902_v19 = vadd.f32 %v1901_v6, %v1900_v59  ;;  %v1917_v26 = vrot.slane %v1916_v27, 1 }
 0x300   :  { %v1910_v49 = vadd.f32 %v1909_v25, %v1908_v61  ;;  %v1925_v24 = vrot.slane %v1924_v51, 1  ;;  %v1933_v34 = vrot.slane %v1932_v46, 1  ;;  %v1940_v62 = vadd.f32 %v1939_v37, %v1938_v32 }
 0x301   :  { %v1918_v35 = vadd.f32 %v1917_v26, %v1916_v27  ;;  %v1943_v33 = vsel %vm58_vm0, %v4815_v16, 0.0  ;;  %v1951_v31 = vsel %vm58_vm0, %v1878_v60, 0.0  ;;  %v1960_v15 = vmul.f32 %v4773_v3, %v1886_v30 }
 0x302   :  { %v1926_v10 = vadd.f32 %v1925_v24, %v1924_v51  ;;  %v1934_v53 = vadd.f32 %v1933_v34, %v1932_v46  ;;  %v1941_v44 = vrot.slane %v1940_v62, 1  ;;  %v1944_v45 = vadd.f32 %v1943_v33, %v4812_v12 }
 0x303   :  { %v1952_v7 = vadd.f32 %v1951_v31, %v4818_v41  ;;  %v1961_v50 = vmul.f32 %v4773_v3, %v1894_v11  ;;  %v1962_v14 = vmul.f32 %v4773_v3, %v1902_v19  ;;  %v1963_v55 = vmul.f32 %v4773_v3, %v1910_v49 }
 0x304   :  { %v1600_v0 = vrot.slane %v4786_v18, 1  ;;  %v1945_v16 = vrot.slane %v1944_v45, 4  ;;  %v1964_v60 = vmul.f32 %v4773_v3, %v1918_v35  ;;  %v1965_v21 = vmul.f32 %v4773_v3, %v1926_v10 }
 0x305   :  { %v1942_v54 = vadd.f32 %v1941_v44, %v1940_v62  ;;  %v1953_v22 = vrot.slane %v1952_v7, 4  ;;  %v1970_v52 = vadd.f32 %v1960_v15, %v4765_v13  ;;  %v1971_v12 = vadd.f32 %v1961_v50, %v4768_v39 }
 0x306   :  { %v1946_v41 = vadd.f32 %v1945_v16, %v1944_v45  ;;  %v1966_v47 = vmul.f32 %v4773_v3, %v1934_v53  ;;  %v1972_v36 = vadd.f32 %v1962_v14, %v4771_v4  ;;  %v1973_v63 = vadd.f32 %v1963_v55, %v4776_v9  ;;  %v3222_v16 = vld [vmem:[%s5067_s6 + $0x8] sm:$0xff]  }
 0x307   :  { %v1593_v38 = vadd.f32 %v1592_v40, %v4762_v8  ;;  %v1954_v1 = vadd.f32 %v1953_v22, %v1952_v7  ;;  %v1974_v2 = vadd.f32 %v1964_v60, %v4779_v29  ;;  %v1975_v17 = vadd.f32 %v1965_v21, %v4782_v48  ;;  %v3223_v60 = vld [vmem:[%s5067_s6 + $0x10] sm:$0xff]   ;;  %v3224_v21 = vld [vmem:[%s5067_s6 + $0x18] sm:$0xff]   ;;  %v3226_v22 = vld [vmem:[%s5067_s6 + $0x28] sm:$0xff]  }
 0x308   :  { %v1601_v13 = vadd.f32 %v1600_v0, %v4786_v18  ;;  %v1947_v59 = vrot.slane %v1946_v41, 2  ;;  %v1980_v39 = vpack.c.bf16 %v1970_v52, %v1970_v52  ;;  %v1981_v28 = vpack.c.bf16 %v1971_v12, %v1971_v12  ;;  %v3227_v52 = vld [vmem:[%s5067_s6 + $0x30] sm:$0xff]   ;;  %v3228_v12 = vld [vmem:[%s5067_s6 + $0x38] sm:$0xff]  }
 0x309   :  { %v1955_v61 = vrot.slane %v1954_v1, 2  ;;  %v1967_v43 = vmul.f32 %v4773_v3, %v1942_v54  ;;  %v1982_v4 = vpack.c.bf16 %v1972_v36, %v1972_v36  ;;  %v1983_v23 = vpack.c.bf16 %v1973_v63, %v1973_v63  ;;  %v3225_v54 = vld [vmem:[%s5067_s6 + $0x20] sm:$0xff]  }
 0x30a   :  { %v1948_v9 = vadd.f32 %v1947_v59, %v1946_v41  ;;  %v1976_v32 = vadd.f32 %v1966_v47, %v4789_v5  ;;  %v1984_v56 = vpack.c.bf16 %v1974_v2, %v1974_v2  ;;  %v1985_v8 = vpack.c.bf16 %v1975_v17, %v1975_v17  ;;  %v3229_v41 = vld [vmem:[%s5069_s8] sm:$0xff]   ;;  %v2095_v17 = vpop.permute.xlu0 %2094 }
 0x30b   :  { %v1956_v40 = vadd.f32 %v1955_v61, %v1954_v1  ;;  %v2152_v57 = vunpack.c.l.b16 %v1980_v39  ;;  %v2153_v29 = vunpack.c.l.b16 %v1981_v28  ;;  %v2154_v6 = vunpack.c.l.b16 %v1982_v4  ;;  %3182 = vmatprep.mubr.bf16.mxu1 %v3229_v41  ;;  %v2100_v1 = vpop.permute.xlu1 %2099 }
 0x30c   :  { %v1611_v48 = vmul.f32 %v4760_v58, %v1593_v38  ;;  %v1949_v18 = vrot.slane %v1948_v9, 1  ;;  %v1977_v25 = vadd.f32 %v1967_v43, %v4792_v42  ;;  %v2155_v51 = vunpack.c.l.b16 %v1983_v23 }
 0x30d   :  { %v1957_v27 = vrot.slane %v1956_v40, 1  ;;  %v2162_v46 = vsel %vm921_vm6, %v2153_v29, %v2152_v57  ;;  %v1986_v30 = vpack.c.bf16 %v1976_v32, %v1976_v32  ;;  %v2156_v11 = vunpack.c.l.b16 %v1984_v56 }
 0x30e   :  { %v1950_v37 = vadd.f32 %v1949_v18, %v1948_v9  ;;  %v2163_v5 = vsel %vm923_vm7, %v2154_v6, %v2162_v46  ;;  %v1612_v19 = vmul.f32 %v4760_v58, %v1601_v13  ;;  %v2157_v49 = vunpack.c.l.b16 %v1985_v8  ;;  %v2085_v61 = vpop.permute.xlu0 %2084 }
 0x30f   :  { %v1958_v26 = vadd.f32 %v1957_v27, %v1956_v40  ;;  %v2164_v24 = vsel %vm925_vm8, %v2155_v51, %v2163_v5  ;;  %v1987_v35 = vpack.c.bf16 %v1977_v25, %v1977_v25  ;;  %v2158_v15 = vunpack.c.l.b16 %v1986_v30  ;;  %v2090_v39 = vpop.permute.xlu1 %2089 }
 0x310   :  { %v1968_v34 = vmul.f32 %v4773_v3, %v1950_v37  ;;  %v2165_v62 = vsel %vm927_vm9, %v2156_v11, %v2164_v24  ;;  %vm2195_vm0 = vcmask 1044480  }
 0x311   :  { %v1969_v42 = vmul.f32 %v4773_v3, %v1958_v26  ;;  %v2166_v33 = vsel %vm929_vm10, %v2157_v49, %v2165_v62  ;;  %v2159_v45 = vunpack.c.l.b16 %v1987_v35 }
 0x312   :  { %v1978_v31 = vadd.f32 %v1968_v34, %v1611_v48  ;;  %v2167_v44 = vsel %vm931_vm11, %v2158_v15, %v2166_v33  ;;  %v2075_v32 = vpop.permute.xlu0 %2074 }
 0x313   :  { %v1979_v10 = vadd.f32 %v1969_v42, %v1612_v19  ;;  %v2168_v14 = vsel %vm933_vm12, %v2159_v45, %v2167_v44  ;;  %v2080_v23 = vpop.permute.xlu1 %2079 }
 0x314   :  { %v1988_v53 = vpack.c.bf16 %v1978_v31, %v1978_v31 }
 0x315   :  { %v1989_v58 = vpack.c.bf16 %v1979_v10, %v1979_v10 }
 0x316   :  { %v2160_v7 = vunpack.c.l.b16 %v1988_v53  ;;  %v2065_v6 = vpop.permute.xlu0 %2064 }
 0x317   :  { %v2161_v50 = vunpack.c.l.b16 %v1989_v58  ;;  %v2070_v40 = vpop.permute.xlu1 %2069 }
 0x319   :  { %v2169_v55 = vsel %vm921_vm6, %v2161_v50, %v2160_v7 }
 0x31a   :  { %v2170_v0 = vpack.c.b16 %v2169_v55, %v2168_v14  ;;  %v2055_v24 = vpop.permute.xlu0 %2054 }
 0x31b   :  { %v2060_v11 = vpop.permute.xlu1 %2059 }
 0x31c   :  { %3214 = vmatprep.subr.msk.bf16.mxu0 %vm2195_vm0, %v2170_v0  ;;  %v2197_v3 = vsel %vm2195_vm0, %v2170_v0, 0 }
 0x31d   :  { %3149 = vmatpush3.bf16.msra.mxu0 %v2197_v3 }
 0x31e   :  { %v2045_v44 = vpop.permute.xlu0 %2044 }
 0x31f   :  { %v2050_v31 = vpop.permute.xlu1 %2049 }
 0x320   :  { %3151 = vmatmul.mubr.msk.bf16.vlgmr.msra.gmra.mxu0 %vm937_vm5, %v3222_v16 }
 0x321   :  { %3154 = vmatprep.mubr.msk.bf16.mxu0 %vm937_vm5, %v3223_v60 }
 0x322   :  { %v2035_v16 = vpop.permute.xlu0 %2034 }
 0x323   :  { %v2040_v55 = vpop.permute.xlu1 %2039 }
 0x328   :  { %3155 = vmatmul.mubr.msk.bf16.gmra.mxu0 %vm937_vm5, %v3224_v21 }
 0x329   :  { %3158 = vmatprep.mubr.msk.bf16.mxu0 %vm937_vm5, %v3225_v54 }
 0x330   :  { %3159 = vmatmul.mubr.msk.bf16.gmra.mxu0 %vm937_vm5, %v3226_v22 }
 0x331   :  { %3162 = vmatprep.mubr.msk.bf16.mxu0 %vm937_vm5, %v3227_v52 }
 0x338   :  { %3163 = vmatmul.mubr.msk.bf16.gmra.mxu0 %vm937_vm5, %v3228_v12  ;;  %v2030_v12 = vpop.permute.xlu1 %2029 }
 0x3e0   :  { %v4898_v47 = vpop.f32.mrf.mxu0 }
 0x3e1   :  { %v2242_v22 = vadd.f32 %v4898_v47, %v2035_v16  ;;  %v3230_v47 = vld [vmem:[%s5069_s8 + $0x8] sm:$0xff]  }
 0x3e2   :  { %v4900_v36 = vpop.f32.mrf.mxu0 }
 0x3e4   :  { %v3153_v63 = vpop.f32.mrf.mxu0 }
 0x3e5   :  { %v2245_v60 = vadd.f32 %v3153_v63, %v2040_v55 }
 0x3e6   :  { %v4902_v38 = vpop.f32.mrf.mxu0 }
 0x3e7   :  { %v2299_v41 = vmax.f32 %v2245_v60, 0.0 }
 0x3e8   :  { %v3156_v2 = vpop.f32.mrf.mxu0 }
 0x3e9   :  { %v2258_v58 = vadd.f32 %v3156_v2, %v2055_v24 }
 0x3ea   :  { %v2249_v13 = vpop.f32.mrf.mxu0 }
 0x3eb   :  { %v2302_v0 = vmax.f32 %v2258_v58, 0.0  ;;  %v2250_v3 = vadd.f32 %v2249_v13, %v2045_v44 }
 0x3ec   :  { %v3157_v59 = vpop.f32.mrf.mxu0 }
 0x3ed   :  { %v2261_v15 = vadd.f32 %v3157_v59, %v2060_v11  ;;  %v2300_v52 = vmax.f32 %v2250_v3, 0.0  ;;  %v2298_v59 = vmax.f32 %v2242_v22, 0.0 }
 0x3ee   :  { %v2252_v28 = vpop.f32.mrf.mxu0 }
 0x3ef   :  { %v2303_v7 = vmax.f32 %v2261_v15, 0.0  ;;  %v2253_v50 = vadd.f32 %v2252_v28, %v2050_v31  ;;  %v4991_v15 = vld.sshfl [vmem:[%s5071_s10] sm:$0x11 pattern:$0x75316420]  ;;  %s3462_s10 = smov [#allocation5]  }
 0x3f0   :  { %v3160_v43 = vpop.f32.mrf.mxu0  ;;  %s2928_s0 = sshll.u32 %s3462_s10, 4  ;;  %s2929_s0 = int_to_ptr.vmem [resolvable:$true] %s2928_s0 }
 0x3f1   :  { %v2274_v5 = vadd.f32 %v3160_v43, %v2075_v32  ;;  %v2315_v21 = vpack.c.bf16 %v2303_v7, %v2302_v0  ;;  %v2301_v54 = vmax.f32 %v2253_v50, 0.0  ;;  %v3233_v43 = vld [vmem:[%s5069_s8 + $0x20] sm:$0xff]   ;;  %s3435_s2 = scalar_lea.vmem %s2929_s0, 32  ;;  %p3440_p6 = scmp.lt.s32.totalorder %s2929_s0, %s2929_s0 }
 0x3f2   :  { %v2265_v4 = vpop.f32.mrf.mxu0  ;;  %v3237_v32 = vld [vmem:[%s5069_s8 + $0x40] sm:$0xff]   ;;  %p3436_p5 = scmp.ne.s32.totalorder %s2929_s0, %s3435_s2  ;;  %p3441_p7 = scmp.lt.s32.totalorder %s3435_s2, %s3435_s2 }
 0x3f3   :  { %v2306_v35 = vmax.f32 %v2274_v5, 0.0  ;;  %v2266_v33 = vadd.f32 %v2265_v4, %v2065_v6  ;;  %v2314_v2 = vpack.c.bf16 %v2301_v54, %v2300_v52  ;;  %v3234_v4 = vld [vmem:[%s5069_s8 + $0x28] sm:$0xff]   ;;  %v3243_v6 = vld [vmem:[%s5069_s8 + $0x70] sm:$0xff]  }
 0x3f4   :  { %v3161_v9 = vpop.f32.mrf.mxu0  ;;  %p3442_p8 = por %p3441_p7, %p3440_p6 }
 0x3f5   :  { %v2277_v51 = vadd.f32 %v3161_v9, %v2080_v23  ;;  %v2304_v45 = vmax.f32 %v2266_v33, 0.0  ;;  %v3235_v23 = vld [vmem:[%s5069_s8 + $0x30] sm:$0xff]   ;;  %v3236_v9 = vld [vmem:[%s5069_s8 + $0x38] sm:$0xff]  }
 0x3f6   :  { %v2268_v56 = vpop.f32.mrf.mxu0  ;;  %p3443_p9 = pnand %p3442_p8, %p3436_p5 }
 0x3f7   :  { %v2307_v34 = vmax.f32 %v2277_v51, 0.0  ;;  %v2269_v62 = vadd.f32 %v2268_v56, %v2070_v40  ;;  %v3238_v56 = vld [vmem:[%s5069_s8 + $0x48] sm:$0xff]   ;;  %v3240_v40 = vld [vmem:[%s5069_s8 + $0x58] sm:$0xff]  }
 0x3f8   :  { %v3164_v8 = vpop.f32.mrf.mxu0 }
 0x3f9   :  { %v2290_v29 = vadd.f32 %v3164_v8, %v2095_v17  ;;  %v2317_v10 = vpack.c.bf16 %v2307_v34, %v2306_v35  ;;  %v2305_v53 = vmax.f32 %v2269_v62, 0.0  ;;  %v2025_v17 = vpop.permute.xlu0 %2024  ;;  %v3239_v8 = vld [vmem:[%s5069_s8 + $0x50] sm:$0xff]  }
 0x3fa   :  { %v2281_v57 = vpop.f32.mrf.mxu0  ;;  %v2234_v13 = vadd.f32 %v4900_v36, %v2025_v17  ;;  %v3232_v36 = vld [vmem:[%s5069_s8 + $0x18] sm:$0xff]  }
 0x3fb   :  { %v2282_v18 = vadd.f32 %v2281_v57, %v2085_v61  ;;  %v2310_v46 = vmax.f32 %v2290_v29, 0.0  ;;  %v2316_v14 = vpack.c.bf16 %v2305_v53, %v2304_v45  ;;  %v3241_v57 = vld [vmem:[%s5069_s8 + $0x60] sm:$0xff]   ;;  %v3242_v29 = vld [vmem:[%s5069_s8 + $0x68] sm:$0xff]  }
 0x3fc   :  { %v3165_v48 = vpop.f32.mrf.mxu0  ;;  %v2296_v28 = vmax.f32 %v2234_v13, 0.0 }
 0x3fd   :  { %v2293_v27 = vadd.f32 %v3165_v48, %v2100_v1  ;;  %v2308_v19 = vmax.f32 %v2282_v18, 0.0  ;;  %v2237_v1 = vadd.f32 %v4902_v38, %v2030_v12  ;;  %v3231_v38 = vld [vmem:[%s5069_s8 + $0x10] sm:$0xff]   ;;  %v3244_v48 = vld [vmem:[%s5069_s8 + $0x78] sm:$0xff]   ;;  %v4952_v18 = vpop.permute.xlu0 %2536 }
 0x3fe   :  { %v2284_v25 = vpop.f32.mrf.mxu0 }
 0x3ff   :  { %v2311_v37 = vmax.f32 %v2293_v27, 0.0  ;;  %v2285_v30 = vadd.f32 %v2284_v25, %v2090_v39  ;;  %v2313_v39 = vpack.c.bf16 %v2299_v41, %v2298_v59  ;;  %v2297_v63 = vmax.f32 %v2237_v1, 0.0  ;;  %v4954_v27 = vpop.permute.xlu1 %2541 }
 0x401   :  { %v2309_v26 = vmax.f32 %v2285_v30, 0.0  ;;  %v2319_v49 = vpack.c.bf16 %v2311_v37, %v2310_v46  ;;  %v2312_v61 = vpack.c.bf16 %v2297_v63, %v2296_v28  ;;  %v4956_v25 = vpop.permute.xlu0 %2456 }
 0x403   :  { %v2318_v42 = vpack.c.bf16 %v2309_v26, %v2308_v19  ;;  %3166 = vmatprep.subr.bf16.mxu1 %v2319_v49  ;;  %v4958_v51 = vpop.permute.xlu1 %2461 }
 0x404   :  { %3167 = vmatpush3.bf16.msra.mxu1 %v2319_v49 }
 0x405   :  { %3168 = vmatprep.subr.bf16.mxu1 %v2318_v42  ;;  %v4960_v46 = vpop.permute.xlu0 %2526 }
 0x407   :  { %v4962_v37 = vpop.permute.xlu1 %2531 }
 0x408   :  { %3169 = vmatpush3.bf16.msra.mxu1 %v2318_v42 }
 0x409   :  { %3170 = vmatprep.subr.bf16.mxu1 %v2317_v10  ;;  %v4964_v30 = vpop.permute.xlu0 %2446 }
 0x40b   :  { %v4966_v11 = vpop.permute.xlu1 %2451 }
 0x40c   :  { %3171 = vmatpush3.bf16.msra.mxu1 %v2317_v10  ;;  %v2864_v10 = vcombine.high %v4991_v15, %v4991_v15 }
 0x40d   :  { %3172 = vmatprep.subr.bf16.mxu1 %v2316_v14  ;;  %v4968_v5 = vpop.permute.xlu0 %2516 }
 0x40e   :  { %v2878_v44 = vrot.slane %v2864_v10, %v3571_v20 }
 0x40f   :  { %v4970_v19 = vpop.permute.xlu1 %2521 }
 0x410   :  { %3173 = vmatpush3.bf16.msra.mxu1 %v2316_v14  ;;  %2913 = vmatprep.mubr.bf16.mxu0 %v2878_v44 }
 0x411   :  { %3174 = vmatprep.subr.bf16.mxu1 %v2315_v21  ;;  %v4972_v26 = vpop.permute.xlu0 %2436 }
 0x413   :  { %v4974_v49 = vpop.permute.xlu1 %2441 }
 0x414   :  { %3175 = vmatpush3.bf16.msra.mxu1 %v2315_v21 }
 0x415   :  { %3176 = vmatprep.subr.bf16.mxu1 %v2314_v2  ;;  %v4976_v24 = vpop.permute.xlu0 %2506 }
 0x417   :  { %v4978_v34 = vpop.permute.xlu1 %2511 }
 0x418   :  { %3177 = vmatpush3.bf16.msra.mxu1 %v2314_v2 }
 0x419   :  { %3178 = vmatprep.subr.bf16.mxu1 %v2313_v39  ;;  %v4980_v62 = vpop.permute.xlu0 %2426 }
 0x41b   :  { %v4982_v42 = vpop.permute.xlu1 %2431 }
 0x41c   :  { %3179 = vmatpush3.bf16.msra.mxu1 %v2313_v39 }
 0x41d   :  { %3180 = vmatprep.subr.bf16.mxu1 %v2312_v61  ;;  %v4984_v35 = vpop.permute.xlu0 %2496 }
 0x41f   :  { %v4986_v33 = vpop.permute.xlu1 %2501 }
 0x420   :  { %3181 = vmatpush3.bf16.msra.mxu1 %v2312_v61 }
 0x421   :  { %v2417_v31 = vpop.permute.xlu0 %2416 }
 0x423   :  { %3183 = vmatmul.mubr.bf16.vlgmr.msra.gmra.mxu1 %v3230_v47  ;;  %v2422_v53 = vpop.permute.xlu1 %2421 }
 0x424   :  { %3186 = vmatprep.mubr.bf16.mxu1 %v3231_v38 }
 0x425   :  { %v4996_v58 = vpop.permute.xlu0 %2486 }
 0x427   :  { %v4998_v45 = vpop.permute.xlu1 %2491 }
 0x429   :  { %v2407_v7 = vpop.permute.xlu0 %2406 }
 0x42b   :  { %3187 = vmatmul.mubr.bf16.gmra.mxu1 %v3232_v36  ;;  %v2412_v50 = vpop.permute.xlu1 %2411 }
 0x42c   :  { %3190 = vmatprep.mubr.bf16.mxu1 %v3233_v43 }
 0x42d   :  { %v5000_v14 = vpop.permute.xlu0 %2476 }
 0x42f   :  { %v5002_v55 = vpop.permute.xlu1 %2481 }
 0x431   :  { %v2397_v0 = vpop.permute.xlu0 %2396 }
 0x433   :  { %3191 = vmatmul.mubr.bf16.gmra.mxu1 %v3234_v4  ;;  %v2402_v3 = vpop.permute.xlu1 %2401 }
 0x434   :  { %3194 = vmatprep.mubr.bf16.mxu1 %v3235_v23 }
 0x435   :  { %v5004_v16 = vpop.permute.xlu0 %2466 }
 0x437   :  { %v5006_v60 = vpop.permute.xlu1 %2471 }
 0x439   :  { %v2387_v52 = vpop.permute.xlu0 %2386 }
 0x43b   :  { %3195 = vmatmul.mubr.bf16.gmra.mxu1 %v3236_v9  ;;  %v2392_v2 = vpop.permute.xlu1 %2391 }
 0x43c   :  { %3198 = vmatprep.mubr.bf16.mxu1 %v3237_v32 }
 0x443   :  { %3199 = vmatmul.mubr.bf16.gmra.mxu1 %v3238_v56 }
 0x444   :  { %3202 = vmatprep.mubr.bf16.mxu1 %v3239_v8 }
 0x44b   :  { %3203 = vmatmul.mubr.bf16.gmra.mxu1 %v3240_v40 }
 0x44c   :  { %3206 = vmatprep.mubr.bf16.mxu1 %v3241_v57 }
 0x453   :  { %3207 = vmatmul.mubr.bf16.gmra.mxu1 %v3242_v29 }
 0x454   :  { %3210 = vmatprep.mubr.bf16.mxu1 %v3243_v6 }
 0x45b   :  { %3211 = vmatmul.mubr.bf16.gmra.mxu1 %v3244_v48 }
 0x4e3   :  { %v3184_v21 = vpop.f32.mrf.mxu1 }
 0x4e4   :  { %v2683_v22 = vadd.f32 %v3184_v21, %v2397_v0 }
 0x4e5   :  { %v2674_v54 = vpop.f32.mrf.mxu1 }
 0x4e6   :  { %v2675_v41 = vadd.f32 %v2674_v54, %v2387_v52  ;;  %v2803_v59 = vmax.f32 %v2683_v22, 0.0 }
 0x4e7   :  { %v3185_v12 = vpop.f32.mrf.mxu1 }
 0x4e8   :  { %v2686_v1 = vadd.f32 %v3185_v12, %v2402_v3  ;;  %v2801_v28 = vmax.f32 %v2675_v41, 0.0 }
 0x4e9   :  { %v2677_v17 = vpop.f32.mrf.mxu1 }
 0x4ea   :  { %v2804_v13 = vmax.f32 %v2686_v1, 0.0  ;;  %v2678_v39 = vadd.f32 %v2677_v17, %v2392_v2 }
 0x4eb   :  { %v3188_v63 = vpop.f32.mrf.mxu1 }
 0x4ec   :  { %v5008_v61 = vpack.c.bf16 %v2804_v13, %v2803_v59  ;;  %v2802_v47 = vmax.f32 %v2678_v39, 0.0  ;;  %v2699_v43 = vadd.f32 %v3188_v63, %v2417_v31 }
 0x4ed   :  { %v2690_v38 = vpop.f32.mrf.mxu1 }
 0x4ee   :  { %v5010_v36 = vpack.c.bf16 %v2802_v47, %v2801_v28  ;;  %v2691_v23 = vadd.f32 %v2690_v38, %v2407_v7  ;;  %v2807_v56 = vmax.f32 %v2699_v43, 0.0 }
 0x4ef   :  { %v3189_v4 = vpop.f32.mrf.mxu1 }
 0x4f0   :  { %v2702_v9 = vadd.f32 %v3189_v4, %v2422_v53  ;;  %v2805_v29 = vmax.f32 %v2691_v23, 0.0 }
 0x4f1   :  { %v2693_v32 = vpop.f32.mrf.mxu1 }
 0x4f2   :  { %v2808_v8 = vmax.f32 %v2702_v9, 0.0  ;;  %v2694_v40 = vadd.f32 %v2693_v32, %v2412_v50 }
 0x4f3   :  { %v3192_v57 = vpop.f32.mrf.mxu1 }
 0x4f4   :  { %v5012_v6 = vpack.c.bf16 %v2808_v8, %v2807_v56  ;;  %v2806_v48 = vmax.f32 %v2694_v40, 0.0 }
 0x4f5   :  { %v2706_v10 = vpop.f32.mrf.mxu1 }
 0x4f6   :  { %v5014_v44 = vpack.c.bf16 %v2806_v48, %v2805_v29 }
 0x4f7   :  { %v3193_v0 = vpop.f32.mrf.mxu1 }
 0x4f9   :  { %v2709_v3 = vpop.f32.mrf.mxu1 }
 0x4fb   :  { %v3196_v21 = vpop.f32.mrf.mxu1 }
 0x4fc   :  { %v2731_v43 = vadd.f32 %v3196_v21, %v4956_v25 }
 0x4fd   :  { %v2722_v54 = vpop.f32.mrf.mxu1 }
 0x4ff   :  { %v3197_v31 = vpop.f32.mrf.mxu1 }
 0x500   :  { %v2734_v28 = vadd.f32 %v3197_v31, %v4958_v51  ;;  %v2815_v31 = vmax.f32 %v2731_v43, 0.0 }
 0x501   :  { %v2725_v22 = vpop.f32.mrf.mxu1 }
 0x502   :  { %v2816_v32 = vmax.f32 %v2734_v28, 0.0  ;;  %v2726_v56 = vadd.f32 %v2725_v22, %v4966_v11 }
 0x503   :  { %v5016_v7 = vpop.f32.mrf.mxu1 }
 0x504   :  { %v2841_v28 = vpack.c.bf16 %v2816_v32, %v2815_v31 }
 0x505   :  { %v5018_v53 = vpop.f32.mrf.mxu1 }
 0x507   :  { %v5020_v52 = vpop.f32.mrf.mxu1 }
 0x509   :  { %v5022_v50 = vpop.f32.mrf.mxu1 }
 0x50b   :  { %v3204_v12 = vpop.f32.mrf.mxu1 }
 0x50d   :  { %v2754_v41 = vpop.f32.mrf.mxu1 }
 0x50f   :  { %v3205_v1 = vpop.f32.mrf.mxu1 }
 0x511   :  { %v2757_v2 = vpop.f32.mrf.mxu1 }
 0x513   :  { %v3208_v17 = vpop.f32.mrf.mxu1 }
 0x514   :  { %v2779_v25 = vadd.f32 %v3208_v17, %v4968_v5 }
 0x515   :  { %v2770_v59 = vpop.f32.mrf.mxu1 }
 0x517   :  { %v3209_v13 = vpop.f32.mrf.mxu1 }
 0x518   :  { %v2782_v40 = vadd.f32 %v3209_v13, %v4970_v19  ;;  %v2715_v13 = vadd.f32 %v3192_v57, %v4972_v26  ;;  %v2763_v26 = vadd.f32 %v3204_v12, %v4984_v35  ;;  %v2747_v12 = vadd.f32 %v5016_v7, %v5000_v14 }
 0x519   :  { %v2773_v39 = vpop.f32.mrf.mxu1 }
 0x51a   :  { %v2828_v11 = vmax.f32 %v2782_v40, 0.0  ;;  %v2774_v22 = vadd.f32 %v2773_v39, %v4978_v34  ;;  %v2707_v34 = vadd.f32 %v2706_v10, %v4980_v62  ;;  %v2750_v62 = vadd.f32 %v5020_v52, %v5002_v55 }
 0x51b   :  { %v3212_v63 = vpop.f32.mrf.mxu1 }
 0x51c   :  { %v2795_v38 = vadd.f32 %v3212_v63, %v4952_v18  ;;  %v2723_v18 = vadd.f32 %v2722_v54, %v4964_v30  ;;  %v2771_v30 = vadd.f32 %v2770_v59, %v4976_v24  ;;  %v2710_v54 = vadd.f32 %v2709_v3, %v4982_v42 }
 0x51d   :  { %v2786_v47 = vpop.f32.mrf.mxu1  ;;  %v2826_v43 = vmax.f32 %v2774_v22, 0.0  ;;  %v2758_v59 = vadd.f32 %v2757_v2, %v4998_v45  ;;  %v2809_v42 = vmax.f32 %v2707_v34, 0.0  ;;  %v2823_v3 = vmax.f32 %v2763_v26, 0.0 }
 0x51e   :  { %v2787_v23 = vadd.f32 %v2786_v47, %v4960_v46  ;;  %v2831_v29 = vmax.f32 %v2795_v38, 0.0  ;;  %v2814_v47 = vmax.f32 %v2726_v56, 0.0  ;;  %v2827_v38 = vmax.f32 %v2779_v25, 0.0 }
 0x51f   :  { %v3213_v4 = vpop.f32.mrf.mxu1  ;;  %v2825_v57 = vmax.f32 %v2771_v30, 0.0  ;;  %v2822_v35 = vmax.f32 %v2758_v59, 0.0  ;;  %v2820_v45 = vmax.f32 %v2750_v62, 0.0  ;;  %v2742_v2 = vadd.f32 %v5022_v50, %v5006_v60 }
 0x520   :  { %v2798_v9 = vadd.f32 %v3213_v4, %v4954_v27  ;;  %v2829_v21 = vmax.f32 %v2787_v23, 0.0  ;;  %v2718_v27 = vadd.f32 %v3193_v0, %v4974_v49  ;;  %v2766_v49 = vadd.f32 %v3205_v1, %v4986_v33 }
 0x521   :  { %v2789_v8 = vpop.f32.mrf.mxu1  ;;  %v2847_v0 = vpack.c.bf16 %v2828_v11, %v2827_v38  ;;  %v2811_v4 = vmax.f32 %v2715_v13, 0.0  ;;  %v2810_v23 = vmax.f32 %v2710_v54, 0.0  ;;  %v2755_v33 = vadd.f32 %v2754_v41, %v4996_v58 }
 0x522   :  { %v2832_v48 = vmax.f32 %v2798_v9, 0.0  ;;  %v2790_v51 = vadd.f32 %v2789_v8, %v4962_v37  ;;  %v2813_v37 = vmax.f32 %v2723_v18, 0.0  ;;  %v2812_v5 = vmax.f32 %v2718_v27, 0.0 }
 0x523   :  { %v2824_v24 = vmax.f32 %v2766_v49, 0.0  ;;  %v2846_v9 = vpack.c.bf16 %v2826_v43, %v2825_v57  ;;  %v2838_v1 = vpack.c.bf16 %v2810_v23, %v2809_v42  ;;  %v2821_v32 = vmax.f32 %v2755_v33, 0.0 }
 0x524   :  { %v2849_v63 = vpack.c.bf16 %v2832_v48, %v2831_v29  ;;  %v2830_v46 = vmax.f32 %v2790_v51, 0.0  ;;  %v2840_v17 = vpack.c.bf16 %v2814_v47, %v2813_v37  ;;  %v2839_v39 = vpack.c.bf16 %v2812_v5, %v2811_v4 }
 0x525   :  { %v2845_v10 = vpack.c.bf16 %v2824_v24, %v2823_v3  ;;  %v2844_v56 = vpack.c.bf16 %v2822_v35, %v2821_v32  ;;  %v2819_v58 = vmax.f32 %v2747_v12, 0.0  ;;  %v2739_v41 = vadd.f32 %v5018_v53, %v5004_v16  ;;  %v2854_v53 = vpop.permute.xlu0 %2853 }
 0x526   :  { %v2848_v19 = vpack.c.bf16 %v2830_v46, %v2829_v21  ;;  %3063 = vmatprep.subr.bf16.mxu0 %v2849_v63  ;;  %v2818_v52 = vmax.f32 %v2742_v2, 0.0  ;;  %v2871_v60 = vrot.slane %v4991_v15, %v3571_v20 }
 0x527   :  { %3064 = vmatpush3.bf16.msra.mxu0 %v2841_v28  ;;  %v2843_v55 = vpack.c.bf16 %v2820_v45, %v2819_v58  ;;  %v2817_v8 = vmax.f32 %v2739_v41, 0.0 }
 0x528   :  { %3065 = vmatprep.subr.bf16.mxu0 %v2848_v19 }
 0x529   :  { %v2842_v14 = vpack.c.bf16 %v2818_v52, %v2817_v8 }
 0x52b   :  { %3066 = vmatpush3.bf16.msra.mxu0 %v2840_v17 }
 0x52c   :  { %3067 = vmatprep.subr.bf16.mxu0 %v2847_v0 }
 0x52f   :  { %3068 = vmatpush3.bf16.msra.mxu0 %v2839_v39 }
 0x530   :  { %3069 = vmatprep.subr.bf16.mxu0 %v2846_v9 }
 0x533   :  { %3070 = vmatpush3.bf16.msra.mxu0 %v2838_v1 }
 0x534   :  { %3071 = vmatprep.subr.bf16.mxu0 %v2845_v10 }
 0x537   :  { %3072 = vmatpush3.bf16.msra.mxu0 %v5012_v6 }
 0x538   :  { %3073 = vmatprep.subr.bf16.mxu0 %v2844_v56 }
 0x53b   :  { %3074 = vmatpush3.bf16.msra.mxu0 %v5014_v44 }
 0x53c   :  { %3075 = vmatprep.subr.bf16.mxu0 %v2843_v55 }
 0x53f   :  { %3076 = vmatpush3.bf16.msra.mxu0 %v5008_v61 }
 0x540   :  { %3077 = vmatprep.subr.bf16.mxu0 %v2842_v14 }
 0x543   :  { %3078 = vmatpush3.bf16.msra.mxu0 %v5010_v36 }
 0x546   :  { %2914 = vmatmul.mubr.bf16.vlgmr.msra.gmra.mxu0 %v2871_v60 }
 0x606   :  { %v3079_v6 = vpop.f32.mrf.mxu0 }
 0x608   :  { %v3080_v7 = vpop.f32.mrf.mxu0 }
 0x609   :  { %v3081_v16 = vadd.f32 %v3080_v7, %v3079_v6 }
 0x60a   :  { %v3082_v50 = vpop.f32.mrf.mxu0 }
 0x60b   :  { %v2916_v44 = vadd.f32 %v3081_v16, %v2854_v53 }
 0x60c   :  { %v3083_v40 = vpop.f32.mrf.mxu0 }
 0x60d   :  { %2921 = vst [vmem:[#allocation5] sm:$0x3] %v2916_v44 }
 0x60e   :  { %3446 = shalt.err (!%p3443_p9)
}
 0x60f   :  { %2931 = dma.vmem_to_hbm [thread:$0]  %s2929_s0, 32, %s5073_s12, [#allocation3]  }
 0x610   :  { %3457 = dma.done.wait [#allocation3], 32  }
 0x611   :  { %3458 = vsyncadd [#allocation3], 4294967264 }
 0x612   :  { %2935 = vsyncpa [#allocation3], 1 }
 0x613   :  { %2936 = vsyncpa [#allocation4], 1 }

</bundles_post_ra>
